<compile_context>
chip_gen: v5e
topology: v5e:2x2
jax: 0.10.0
libtpu: 0.0.40
codegen_flags: <defaults>
</compile_context>

<pallas_src>
import functools
import math

import jax
import jax.numpy as jnp
from jax.experimental import pallas as pl
from jax.experimental.pallas import tpu as pltpu


def _itemsize(dt):
    return jnp.dtype(dt).itemsize


# ------------------------------ Pallas kernel -------------------------------

def _bilstm_layer_kernel(*refs, tt, batch, hidden, n_chunks, emit_seq):
    """One bidirectional LSTM layer.

    refs (inputs):
      x_refs[k]   : (tt*Bp, Dk)   time-major flattened input chunk k
      wih_refs[k] : (1, Dk, 4H)   W_ih^T chunk for this direction
      whh_ref     : (1, H, 4H)    W_hh^T for this direction
      b_ref       : (1, 1, 4H)    fused bias (b_ih + b_hh), float32
    refs (outputs):
      out_seq_ref : (1, tt*Bp, H) per-timestep hidden states (this direction)
      h_last_ref  : (1, Bp, H)    final hidden state (this direction)
    refs (scratch):
      gx_ref      : (tt*Bp, 4H) f32  hoisted input projection for the block
      hseq_ref    : (tt*Bp, H)  f32  lane-dense staging slab for out_seq
      h_ref, c_ref: (Bp, H)     f32  recurrent state carried across blocks
    """
    n = n_chunks
    x_refs = refs[:n]
    wih_refs = refs[n:2 * n]
    whh_ref = refs[2 * n]
    b_ref = refs[2 * n + 1]
    out_seq_ref = refs[2 * n + 2]
    h_last_ref = refs[2 * n + 3]
    gx_ref = refs[2 * n + 4]
    hseq_ref = refs[2 * n + 5]
    h_ref = refs[2 * n + 6]
    c_ref = refs[2 * n + 7]

    H = hidden
    Bp = batch
    d = pl.program_id(0)           # direction: 0 = forward, 1 = backward
    tb = pl.program_id(1)          # time block (traversal order)
    reverse = d == 1

    # Reset recurrent state at the first time block of each direction.
    @pl.when(tb == 0)
    def _():
        h_ref[...] = jnp.zeros_like(h_ref)
        c_ref[...] = jnp.zeros_like(c_ref)

    # ---- Hoisted input projection: ONE MXU-efficient GEMM per input chunk
    # ---- with M = tt*Bp rows (instead of tt tiny per-step matmuls).
    acc = jnp.dot(x_refs[0][...], wih_refs[0][0],
                  preferred_element_type=jnp.float32)
    for ck in range(1, n):
        acc = acc + jnp.dot(x_refs[ck][...], wih_refs[ck][0],
                            preferred_element_type=jnp.float32)
    gx_ref[...] = acc + b_ref[0]

    whh = whh_ref[0]               # (H, 4H): loaded once, reused every step

    def step(s, h, c):
        # local (within-block) timestep; reversed for the backward direction
        idx = jnp.where(reverse, tt - 1 - s, s)
        row = pl.multiple_of(idx * Bp, 8)
        gates = gx_ref[pl.ds(row, Bp), :] + jnp.dot(
            h.astype(whh.dtype), whh, preferred_element_type=jnp.float32)
        i = jax.nn.sigmoid(gates[:, 0:H])
        f = jax.nn.sigmoid(gates[:, H:2 * H])
        g = jnp.tanh(gates[:, 2 * H:3 * H])
        o = jax.nn.sigmoid(gates[:, 3 * H:4 * H])
        c_new = f * c + i * g
        h_new = o * jnp.tanh(c_new)
        if emit_seq:
            hseq_ref[pl.ds(row, Bp), :] = h_new
        return h_new, c_new

    h = h_ref[...]
    c = c_ref[...]
    if tt <= 32:
        # Full unroll: gives the scheduler cross-iteration visibility so the
        # h @ W_hh MXU push/pop overlaps the previous step's elementwise work.
        for s in range(tt):
            h, c = step(s, h, c)
    else:
        unroll = 4 if tt % 4 == 0 else (2 if tt % 2 == 0 else 1)
        h, c = jax.lax.fori_loop(
            0, tt, lambda s, hc: step(s, *hc), (h, c), unroll=unroll)

    h_ref[...] = h
    c_ref[...] = c

    if emit_seq:
        # One contiguous block store instead of per-step masked output stores.
        out_seq_ref[0] = hseq_ref[...].astype(out_seq_ref.dtype)

    @pl.when(tb == pl.num_programs(1) - 1)
    def _():
        h_last_ref[0] = h.astype(h_last_ref.dtype)


# ------------------------------ layer wrapper --------------------------------

def bilstm_layer_pallas(x_chunks, wih_chunks, whh, b, *, seq_len, batch_padded,
                        emit_seq=True, time_block=None):
    """One bidirectional LSTM layer via a single pallas_call.

    x_chunks:   list of (T*Bp, Dk) arrays (time-major, flattened, batch padded)
    wih_chunks: list of (2, Dk, 4H) arrays (stacked per-direction W_ih^T chunk)
    whh:        (2, H, 4H) stacked W_hh^T
    b:          (2, 1, 4H) float32 fused bias
    Returns (out_seq, h_last):
      out_seq: (2, T*Bp, H) if emit_seq else a small unused dummy
      h_last : (2, Bp, H) float32
    """
    T = int(seq_len)
    Bp = int(batch_padded)
    H = int(whh.shape[1])
    G = 4 * H
    n_chunks = len(x_chunks)
    seq_dtype = whh.dtype
    d_total = sum(int(c.shape[-1]) for c in x_chunks)

    if time_block is None:
        # Per-timestep VMEM footprint (double-buffered I/O blocks + scratch).
        # Budget is conservative enough for v7x's 64 MiB physical VMEM.
        per_t = Bp * (2 * sum(int(c.shape[-1]) * _itemsize(c.dtype)
                              for c in x_chunks)
                      + 2 * H * _itemsize(seq_dtype)
                      + 4 * G + 4 * H)
        budget = 24 << 20
        time_block = 1
        for cand in range(1, T + 1):
            if T % cand == 0 and cand * per_t <= budget:
                time_block = cand
    if T % time_block != 0:
        raise ValueError(f"time_block={time_block} must divide seq_len={T}")
    tt = int(time_block)
    n_tb = T // tt

    dir_map3 = lambda d, t: (d, 0, 0)

    def x_map(d, t):
        # backward direction walks the time blocks in reverse
        return (t + d * (n_tb - 1 - 2 * t), 0)

    in_specs = []
    for c in x_chunks:
        in_specs.append(pl.BlockSpec((tt * Bp, int(c.shape[-1])), x_map))
    for w in wih_chunks:
        in_specs.append(pl.BlockSpec((1, int(w.shape[1]), G), dir_map3))
    in_specs.append(pl.BlockSpec((1, H, G), dir_map3))      # W_hh^T
    in_specs.append(pl.BlockSpec((1, 1, G), dir_map3))      # bias

    if emit_seq:
        out_seq_shape = (2, T * Bp, H)
        seq_spec = pl.BlockSpec(
            (1, tt * Bp, H), lambda d, t: (d, t + d * (n_tb - 1 - 2 * t), 0))
        hseq_shape = (tt * Bp, H)
    else:
        # Final layer + 'last' pooling: skip the dead sequence output.
        out_seq_shape = (2, Bp, H)
        seq_spec = pl.BlockSpec((1, Bp, H), dir_map3)
        hseq_shape = (Bp, H)
    out_specs = (seq_spec, pl.BlockSpec((1, Bp, H), dir_map3))

    scratch_shapes = [
        pltpu.VMEM((tt * Bp, G), jnp.float32),   # gates_x for the current block
        pltpu.VMEM(hseq_shape, jnp.float32),     # lane-dense out_seq staging
        pltpu.VMEM((Bp, H), jnp.float32),        # h carried across time blocks
        pltpu.VMEM((Bp, H), jnp.float32),        # c carried across time blocks
    ]

    kernel = functools.partial(_bilstm_layer_kernel, tt=tt, batch=Bp, hidden=H,
                               n_chunks=n_chunks, emit_seq=emit_seq)

    # VMEM budget: double-buffered I/O blocks + scratch + headroom.
    blk_in = (sum(tt * Bp * int(c.shape[-1]) * _itemsize(c.dtype)
                  for c in x_chunks)
              + sum(int(w.shape[1]) * G * _itemsize(w.dtype)
                    for w in wih_chunks)
              + H * G * _itemsize(whh.dtype) + G * 4)
    blk_out = math.prod(hseq_shape) * _itemsize(seq_dtype) + Bp * H * 4
    scratch_b = 4 * (tt * Bp * G + math.prod(hseq_shape) + 2 * Bp * H)
    vmem_limit = int(min(max(2 * (blk_in + blk_out) + scratch_b + (4 << 20),
                             8 << 20), 64 << 20))

    flops = 4 * T * Bp * G * (d_total + H)
    transcendentals = 2 * T * Bp * 6 * H
    bytes_accessed = int(
        2 * sum(c.size * _itemsize(c.dtype) for c in x_chunks)
        + sum(w.size * _itemsize(w.dtype) for w in wih_chunks)
        + whh.size * _itemsize(whh.dtype) + b.size * 4
        + math.prod(out_seq_shape) * _itemsize(seq_dtype) + 2 * Bp * H * 4)

    return pl.pallas_call(
        kernel,
        out_shape=(jax.ShapeDtypeStruct(out_seq_shape, seq_dtype),
                   jax.ShapeDtypeStruct((2, Bp, H), jnp.float32)),
        grid_spec=pltpu.PrefetchScalarGridSpec(
            num_scalar_prefetch=0,
            grid=(2, n_tb),
            in_specs=in_specs,
            out_specs=out_specs,
            scratch_shapes=scratch_shapes),
        compiler_params=pltpu.CompilerParams(
            dimension_semantics=("parallel", "arbitrary"),
            vmem_limit_bytes=vmem_limit),
        cost_estimate=pl.CostEstimate(flops=flops,
                                      transcendentals=transcendentals,
                                      bytes_accessed=bytes_accessed),
    )(*x_chunks, *wih_chunks, whh, b)


# ------------------------------ module forward -------------------------------

def seq2vec_rnn_forward(x_btd, params, pool_type="last", *,
                        mxu_dtype=jnp.float32, time_block=None):
    """Equivalent of Seq2Vec_RNN.forward (rnn_type='lstm', bidirectional)."""
    B, T, _ = x_btd.shape
    H = int(params[0][0][1].shape[0])            # whh_t is (H, 4H)
    Bp = max(8, ((B + 7) // 8) * 8)               # pad batch to sublane multiple
    x = jnp.transpose(x_btd, (1, 0, 2)).astype(jnp.float32)       # (T, B, D)
    if Bp != B:
        x = jnp.pad(x, ((0, 0), (0, Bp - B), (0, 0)))
    x_chunks = [x.reshape(T * Bp, -1).astype(mxu_dtype)]           # time-major flat

    num_layers = len(params)
    out_seq = None
    h_last = None
    for li, layer_params in enumerate(params):
        (wih_f, whh_f, b_f), (wih_b, whh_b, b_b) = layer_params
        whh = jnp.stack([whh_f, whh_b], 0).astype(mxu_dtype)        # (2, H, 4H)
        b = jnp.stack([b_f, b_b], 0).astype(jnp.float32)            # (2, 1, 4H)
        sizes = [int(c.shape[-1]) for c in x_chunks]
        offs = [0]
        for s in sizes:
            offs.append(offs[-1] + s)
        wih_chunks = [
            jnp.stack([wih_f[offs[k]:offs[k + 1]],
                       wih_b[offs[k]:offs[k + 1]]], 0).astype(mxu_dtype)
            for k in range(len(sizes))]
        emit_seq = not (li == num_layers - 1 and pool_type == "last")
        out_seq, h_last = bilstm_layer_pallas(
            x_chunks, wih_chunks, whh, b, seq_len=T, batch_padded=Bp,
            emit_seq=emit_seq, time_block=time_block)
        if emit_seq:
            # Each direction's output slab directly becomes an input chunk of
            # the next layer (no (T, B, 2H) concatenation copy in HBM).
            x_chunks = [out_seq[0], out_seq[1]]

    if pool_type == "last":
        # torch.cat((h_n[-2], h_n[-1]), dim=-1)
        return jnp.concatenate([h_last[0], h_last[1]], axis=-1)[:B]
    if pool_type in ("mean", "max"):
        # TODO(synk): `sequencial_pool` is undefined in the reference snippet;
        # mean/max over the time axis kept as plain-JAX glue.
        full = out_seq.reshape(2, T, Bp, H).astype(jnp.float32)
        full = jnp.concatenate([full[0], full[1]], axis=-1)[:, :B]   # (T, B, 2H)
        return (jnp.mean(full, axis=0) if pool_type == "mean"
                else jnp.max(full, axis=0))
    raise ValueError(f"Unknown pool_type: {pool_type}")


# --------------------------- params / reference ------------------------------

def init_params(key, input_size, hidden_size, num_layers):
    """Deterministic LSTM parameters (PyTorch-style uniform init).

    params[layer][dir] = (W_ih^T (D_in, 4H), W_hh^T (H, 4H), b_ih+b_hh (1, 4H))
    with PyTorch gate ordering [i, f, g, o].
    """
    bound = 1.0 / math.sqrt(hidden_size)
    params = []
    for layer in range(num_layers):
        d_in = input_size if layer == 0 else 2 * hidden_size
        dir_params = []
        for _ in range(2):  # forward, backward
            key, k1, k2, k3, k4 = jax.random.split(key, 5)
            w_ih = jax.random.uniform(k1, (4 * hidden_size, d_in),
                                      minval=-bound, maxval=bound,
                                      dtype=jnp.float32)
            w_hh = jax.random.uniform(k2, (4 * hidden_size, hidden_size),
                                      minval=-bound, maxval=bound,
                                      dtype=jnp.float32)
            b_ih = jax.random.uniform(k3, (4 * hidden_size,),
                                      minval=-bound, maxval=bound,
                                      dtype=jnp.float32)
            b_hh = jax.random.uniform(k4, (4 * hidden_size,),
                                      minval=-bound, maxval=bound,
                                      dtype=jnp.float32)
            dir_params.append((w_ih.T, w_hh.T, (b_ih + b_hh)[None, :]))
        params.append(dir_params)
    return params


def _ref_lstm_direction(x_tbd, wih_t, whh_t, b, reverse):
    T, B, _ = x_tbd.shape
    H = whh_t.shape[0]
    xs = x_tbd[::-1] if reverse else x_tbd

    def step(carry, x_t):
        h, c = carry
        gates = x_t @ wih_t + h @ whh_t + b
        i = jax.nn.sigmoid(gates[:, 0:H])
        f = jax.nn.sigmoid(gates[:, H:2 * H])
        g = jnp.tanh(gates[:, 2 * H:3 * H])
        o = jax.nn.sigmoid(gates[:, 3 * H:4 * H])
        c = f * c + i * g
        h = o * jnp.tanh(c)
        return (h, c), h

    (h, _), ys = jax.lax.scan(step,
                              (jnp.zeros((B, H), jnp.float32),
                               jnp.zeros((B, H), jnp.float32)), xs)
    if reverse:
        ys = ys[::-1]
    return ys, h


def seq2vec_rnn_reference(x_btd, params, pool_type="last"):
    x = jnp.transpose(x_btd, (1, 0, 2)).astype(jnp.float32)
    h_last_layer = None
    for layer_params in params:
        outs, h_lasts = [], []
        for d, (wih_t, whh_t, b) in enumerate(layer_params):
            o, hT = _ref_lstm_direction(x, wih_t, whh_t, b, reverse=(d == 1))
            outs.append(o)
            h_lasts.append(hT)
        x = jnp.concatenate(outs, axis=-1)
        h_last_layer = h_lasts
    if pool_type == "last":
        return jnp.concatenate(h_last_layer, axis=-1)
    out = jnp.transpose(x, (1, 0, 2))
    return jnp.mean(out, axis=1) if pool_type == "mean" else jnp.max(out, axis=1)


# ---------------------------------- main -------------------------------------

if __name__ == "__main__":
    batch, seq_len, input_size, hidden_size, num_layers = 2, 8, 16, 32, 2

    key = jax.random.PRNGKey(0)
    key, kx = jax.random.split(key)
    x = jax.random.normal(kx, (batch, seq_len, input_size), dtype=jnp.float32)
    params = init_params(key, input_size, hidden_size, num_layers)

    ref_last = jax.block_until_ready(seq2vec_rnn_reference(x, params, "last"))
    ref_mean = jax.block_until_ready(seq2vec_rnn_reference(x, params, "mean"))

    # (a) f32 MXU path, whole sequence as one time block.
    out = jax.block_until_ready(seq2vec_rnn_forward(x, params, "last"))
    assert out.shape == (batch, 2 * hidden_size), out.shape
    assert jnp.allclose(out, ref_last, atol=1e-4, rtol=1e-4), \
        float(jnp.max(jnp.abs(out - ref_last)))

    # (b) time-tiled path (exercises cross-block recurrent-state carry).
    out_tiled = jax.block_until_ready(
        seq2vec_rnn_forward(x, params, "last", time_block=2))
    assert jnp.allclose(out_tiled, ref_last, atol=1e-4, rtol=1e-4), \
        float(jnp.max(jnp.abs(out_tiled - ref_last)))

    # (c) bf16 MXU operands (f32 accumulation + f32 cell math).
    out_bf16 = jax.block_until_ready(
        seq2vec_rnn_forward(x, params, "last", mxu_dtype=jnp.bfloat16))
    assert jnp.allclose(out_bf16, ref_last, atol=5e-2, rtol=5e-2), \
        float(jnp.max(jnp.abs(out_bf16 - ref_last)))

    # (d) mean pooling path (final layer emits its per-timestep output).
    out_mean = jax.block_until_ready(seq2vec_rnn_forward(x, params, "mean"))
    assert jnp.allclose(out_mean, ref_mean, atol=1e-4, rtol=1e-4), \
        float(jnp.max(jnp.abs(out_mean - ref_mean)))

    print("KERNEL_OK")
</pallas_src>

<mosaic_0001>
module attributes {stable_mosaic.version = 11 : i64} {
  func.func @_bilstm_layer_kernel(%arg0: i32, %arg1: i32, %arg2: memref<64x16xf32, #tpu.memory_space<vmem>>, %arg3: memref<1x16x128xf32, #tpu.memory_space<vmem>>, %arg4: memref<1x32x128xf32, #tpu.memory_space<vmem>>, %arg5: memref<1x1x128xf32, #tpu.memory_space<vmem>>, %arg6: memref<1x64x32xf32, #tpu.memory_space<vmem>>, %arg7: memref<1x8x32xf32, #tpu.memory_space<vmem>>, %arg8: memref<64x128xf32, #tpu.memory_space<vmem>>, %arg9: memref<64x32xf32, #tpu.memory_space<vmem>>, %arg10: memref<8x32xf32, #tpu.memory_space<vmem>>, %arg11: memref<8x32xf32, #tpu.memory_space<vmem>>) attributes {dimension_semantics = [#tpu.dimension_semantics<parallel>, #tpu.dimension_semantics<arbitrary>], iteration_bounds = array<i64: 2, 1>, scalar_prefetch = 0 : i64, scratch_operands = 4 : i64, tpu.core_type = #tpu.core_type<tc>, window_params = [{transform_indices = @transform_0, window_bounds = array<i64: 64, 16>}, {transform_indices = @transform_1, window_bounds = array<i64: 1, 16, 128>}, {transform_indices = @transform_2, window_bounds = array<i64: 1, 32, 128>}, {transform_indices = @transform_3, window_bounds = array<i64: 1, 1, 128>}, {transform_indices = @transform_4, window_bounds = array<i64: 1, 64, 32>}, {transform_indices = @transform_5, window_bounds = array<i64: 1, 8, 32>}]} {
    %c1_i32 = arith.constant 1 : i32
    %0 = arith.cmpi eq, %arg0, %c1_i32 : i32
    %c0_i32 = arith.constant 0 : i32
    %1 = arith.cmpi eq, %arg1, %c0_i32 : i32
    %2 = arith.extui %1 : i1 to i32
    %c0_i32_0 = arith.constant 0 : i32
    %3 = arith.cmpi ne, %2, %c0_i32_0 : i32
    scf.if %3 {
      %cst_93 = arith.constant 0.000000e+00 : f32
      %298 = vector.broadcast %cst_93 : f32 to vector<8x32xf32>
      %c0_94 = arith.constant 0 : index
      %c0_95 = arith.constant 0 : index
      %299 = vector.load %arg10[%c0_94, %c0_95] : memref<8x32xf32, #tpu.memory_space<vmem>>, vector<8x32xf32>
      tpu.vector_store %arg10[%c0_94, %c0_95], %298 {strides = array<i32>} : memref<8x32xf32, #tpu.memory_space<vmem>>, vector<8x32xf32>,
      %cst_96 = arith.constant 0.000000e+00 : f32
      %300 = vector.broadcast %cst_96 : f32 to vector<8x32xf32>
      %c0_97 = arith.constant 0 : index
      %c0_98 = arith.constant 0 : index
      %301 = vector.load %arg11[%c0_97, %c0_98] : memref<8x32xf32, #tpu.memory_space<vmem>>, vector<8x32xf32>
      tpu.vector_store %arg11[%c0_97, %c0_98], %300 {strides = array<i32>} : memref<8x32xf32, #tpu.memory_space<vmem>>, vector<8x32xf32>,
    } else {
    }
    %c0 = arith.constant 0 : index
    %c0_1 = arith.constant 0 : index
    %4 = vector.load %arg2[%c0, %c0_1] : memref<64x16xf32, #tpu.memory_space<vmem>>, vector<64x16xf32>
    %c0_2 = arith.constant 0 : index
    %c0_3 = arith.constant 0 : index
    %c0_4 = arith.constant 0 : index
    %5 = vector.load %arg3[%c0_2, %c0_3, %c0_4] : memref<1x16x128xf32, #tpu.memory_space<vmem>>, vector<1x16x128xf32>
    %6 = vector.shape_cast %5 : vector<1x16x128xf32> to vector<16x128xf32>
    %cst = arith.constant dense<0.000000e+00> : vector<64x128xf32>
    %7 = tpu.matmul %4, %6, %cst {dimension_numbers = #tpu.dot_dimension_numbers<[1], [0], [0], [1], [0, 0, 1, 1], [], []>} : vector<64x16xf32>, vector<16x128xf32>, vector<64x128xf32> -> vector<64x128xf32>
    %c0_5 = arith.constant 0 : index
    %c0_6 = arith.constant 0 : index
    %c0_7 = arith.constant 0 : index
    %8 = vector.load %arg5[%c0_5, %c0_6, %c0_7] : memref<1x1x128xf32, #tpu.memory_space<vmem>>, vector<1x1x128xf32>
    %9 = vector.shape_cast %8 : vector<1x1x128xf32> to vector<1x128xf32>
    %10 = vector.broadcast %9 : vector<1x128xf32> to vector<64x128xf32>
    %11 = arith.addf %7, %10 : vector<64x128xf32>
    %c0_8 = arith.constant 0 : index
    %c0_9 = arith.constant 0 : index
    %12 = vector.load %arg8[%c0_8, %c0_9] : memref<64x128xf32, #tpu.memory_space<vmem>>, vector<64x128xf32>
    tpu.vector_store %arg8[%c0_8, %c0_9], %11 {strides = array<i32>} : memref<64x128xf32, #tpu.memory_space<vmem>>, vector<64x128xf32>,
    %c0_10 = arith.constant 0 : index
    %c0_11 = arith.constant 0 : index
    %c0_12 = arith.constant 0 : index
    %13 = vector.load %arg4[%c0_10, %c0_11, %c0_12] : memref<1x32x128xf32, #tpu.memory_space<vmem>>, vector<1x32x128xf32>
    %14 = vector.shape_cast %13 : vector<1x32x128xf32> to vector<32x128xf32>
    %c0_13 = arith.constant 0 : index
    %c0_14 = arith.constant 0 : index
    %15 = vector.load %arg10[%c0_13, %c0_14] : memref<8x32xf32, #tpu.memory_space<vmem>>, vector<8x32xf32>
    %c0_15 = arith.constant 0 : index
    %c0_16 = arith.constant 0 : index
    %16 = vector.load %arg11[%c0_15, %c0_16] : memref<8x32xf32, #tpu.memory_space<vmem>>, vector<8x32xf32>
    %c7_i32 = arith.constant 7 : i32
    %c0_i32_17 = arith.constant 0 : i32
    %17 = arith.select %0, %c7_i32, %c0_i32_17 : i32
    %c8_i32 = arith.constant 8 : i32
    %18 = arith.muli %17, %c8_i32 : i32
    %19 = tpu.assume_multiple %18, 8 : i32
    %20 = arith.index_cast %19 : i32 to index
    %c0_18 = arith.constant 0 : index
    %21 = vector.load %arg8[%20, %c0_18] : memref<64x128xf32, #tpu.memory_space<vmem>>, vector<8x128xf32>
    %cst_19 = arith.constant dense<0.000000e+00> : vector<8x128xf32>
    %22 = tpu.matmul %15, %14, %cst_19 {dimension_numbers = #tpu.dot_dimension_numbers<[1], [0], [0], [1], [0, 0, 1, 1], [], []>} : vector<8x32xf32>, vector<32x128xf32>, vector<8x128xf32> -> vector<8x128xf32>
    %23 = arith.addf %21, %22 : vector<8x128xf32>
    %24 = vector.extract_strided_slice %23 {offsets = [0, 0], sizes = [8, 32], strides = [1, 1]} : vector<8x128xf32> to vector<8x32xf32>
    %25 = arith.negf %24 : vector<8x32xf32>
    %26 = math.exp %25 : vector<8x32xf32>
    %cst_20 = arith.constant 1.000000e+00 : f32
    %27 = vector.broadcast %cst_20 : f32 to vector<8x32xf32>
    %28 = arith.addf %27, %26 : vector<8x32xf32>
    %29 = arith.divf %27, %28 : vector<8x32xf32>
    %30 = vector.extract_strided_slice %23 {offsets = [0, 32], sizes = [8, 32], strides = [1, 1]} : vector<8x128xf32> to vector<8x32xf32>
    %31 = arith.negf %30 : vector<8x32xf32>
    %32 = math.exp %31 : vector<8x32xf32>
    %cst_21 = arith.constant 1.000000e+00 : f32
    %33 = vector.broadcast %cst_21 : f32 to vector<8x32xf32>
    %34 = arith.addf %33, %32 : vector<8x32xf32>
    %35 = arith.divf %33, %34 : vector<8x32xf32>
    %36 = vector.extract_strided_slice %23 {offsets = [0, 64], sizes = [8, 32], strides = [1, 1]} : vector<8x128xf32> to vector<8x32xf32>
    %37 = math.tanh %36 : vector<8x32xf32>
    %38 = vector.extract_strided_slice %23 {offsets = [0, 96], sizes = [8, 32], strides = [1, 1]} : vector<8x128xf32> to vector<8x32xf32>
    %39 = arith.negf %38 : vector<8x32xf32>
    %40 = math.exp %39 : vector<8x32xf32>
    %cst_22 = arith.constant 1.000000e+00 : f32
    %41 = vector.broadcast %cst_22 : f32 to vector<8x32xf32>
    %42 = arith.addf %41, %40 : vector<8x32xf32>
    %43 = arith.divf %41, %42 : vector<8x32xf32>
    %44 = arith.mulf %35, %16 : vector<8x32xf32>
    %45 = arith.mulf %29, %37 : vector<8x32xf32>
    %46 = arith.addf %44, %45 : vector<8x32xf32>
    %47 = math.tanh %46 : vector<8x32xf32>
    %48 = arith.mulf %43, %47 : vector<8x32xf32>
    %49 = arith.index_cast %19 : i32 to index
    %c0_23 = arith.constant 0 : index
    %50 = vector.load %arg9[%49, %c0_23] : memref<64x32xf32, #tpu.memory_space<vmem>>, vector<8x32xf32>
    tpu.vector_store %arg9[%49, %c0_23], %48 {strides = array<i32>} : memref<64x32xf32, #tpu.memory_space<vmem>>, vector<8x32xf32>,
    %c6_i32 = arith.constant 6 : i32
    %c1_i32_24 = arith.constant 1 : i32
    %51 = arith.select %0, %c6_i32, %c1_i32_24 : i32
    %c8_i32_25 = arith.constant 8 : i32
    %52 = arith.muli %51, %c8_i32_25 : i32
    %53 = tpu.assume_multiple %52, 8 : i32
    %54 = arith.index_cast %53 : i32 to index
    %c0_26 = arith.constant 0 : index
    %55 = vector.load %arg8[%54, %c0_26] : memref<64x128xf32, #tpu.memory_space<vmem>>, vector<8x128xf32>
    %cst_27 = arith.constant dense<0.000000e+00> : vector<8x128xf32>
    %56 = tpu.matmul %48, %14, %cst_27 {dimension_numbers = #tpu.dot_dimension_numbers<[1], [0], [0], [1], [0, 0, 1, 1], [], []>} : vector<8x32xf32>, vector<32x128xf32>, vector<8x128xf32> -> vector<8x128xf32>
    %57 = arith.addf %55, %56 : vector<8x128xf32>
    %58 = vector.extract_strided_slice %57 {offsets = [0, 0], sizes = [8, 32], strides = [1, 1]} : vector<8x128xf32> to vector<8x32xf32>
    %59 = arith.negf %58 : vector<8x32xf32>
    %60 = math.exp %59 : vector<8x32xf32>
    %cst_28 = arith.constant 1.000000e+00 : f32
    %61 = vector.broadcast %cst_28 : f32 to vector<8x32xf32>
    %62 = arith.addf %61, %60 : vector<8x32xf32>
    %63 = arith.divf %61, %62 : vector<8x32xf32>
    %64 = vector.extract_strided_slice %57 {offsets = [0, 32], sizes = [8, 32], strides = [1, 1]} : vector<8x128xf32> to vector<8x32xf32>
    %65 = arith.negf %64 : vector<8x32xf32>
    %66 = math.exp %65 : vector<8x32xf32>
    %cst_29 = arith.constant 1.000000e+00 : f32
    %67 = vector.broadcast %cst_29 : f32 to vector<8x32xf32>
    %68 = arith.addf %67, %66 : vector<8x32xf32>
    %69 = arith.divf %67, %68 : vector<8x32xf32>
    %70 = vector.extract_strided_slice %57 {offsets = [0, 64], sizes = [8, 32], strides = [1, 1]} : vector<8x128xf32> to vector<8x32xf32>
    %71 = math.tanh %70 : vector<8x32xf32>
    %72 = vector.extract_strided_slice %57 {offsets = [0, 96], sizes = [8, 32], strides = [1, 1]} : vector<8x128xf32> to vector<8x32xf32>
    %73 = arith.negf %72 : vector<8x32xf32>
    %74 = math.exp %73 : vector<8x32xf32>
    %cst_30 = arith.constant 1.000000e+00 : f32
    %75 = vector.broadcast %cst_30 : f32 to vector<8x32xf32>
    %76 = arith.addf %75, %74 : vector<8x32xf32>
    %77 = arith.divf %75, %76 : vector<8x32xf32>
    %78 = arith.mulf %69, %46 : vector<8x32xf32>
    %79 = arith.mulf %63, %71 : vector<8x32xf32>
    %80 = arith.addf %78, %79 : vector<8x32xf32>
    %81 = math.tanh %80 : vector<8x32xf32>
    %82 = arith.mulf %77, %81 : vector<8x32xf32>
    %83 = arith.index_cast %53 : i32 to index
    %c0_31 = arith.constant 0 : index
    %84 = vector.load %arg9[%83, %c0_31] : memref<64x32xf32, #tpu.memory_space<vmem>>, vector<8x32xf32>
    tpu.vector_store %arg9[%83, %c0_31], %82 {strides = array<i32>} : memref<64x32xf32, #tpu.memory_space<vmem>>, vector<8x32xf32>,
    %c5_i32 = arith.constant 5 : i32
    %c2_i32 = arith.constant 2 : i32
    %85 = arith.select %0, %c5_i32, %c2_i32 : i32
    %c8_i32_32 = arith.constant 8 : i32
    %86 = arith.muli %85, %c8_i32_32 : i32
    %87 = tpu.assume_multiple %86, 8 : i32
    %88 = arith.index_cast %87 : i32 to index
    %c0_33 = arith.constant 0 : index
    %89 = vector.load %arg8[%88, %c0_33] : memref<64x128xf32, #tpu.memory_space<vmem>>, vector<8x128xf32>
    %cst_34 = arith.constant dense<0.000000e+00> : vector<8x128xf32>
    %90 = tpu.matmul %82, %14, %cst_34 {dimension_numbers = #tpu.dot_dimension_numbers<[1], [0], [0], [1], [0, 0, 1, 1], [], []>} : vector<8x32xf32>, vector<32x128xf32>, vector<8x128xf32> -> vector<8x128xf32>
    %91 = arith.addf %89, %90 : vector<8x128xf32>
    %92 = vector.extract_strided_slice %91 {offsets = [0, 0], sizes = [8, 32], strides = [1, 1]} : vector<8x128xf32> to vector<8x32xf32>
    %93 = arith.negf %92 : vector<8x32xf32>
    %94 = math.exp %93 : vector<8x32xf32>
    %cst_35 = arith.constant 1.000000e+00 : f32
    %95 = vector.broadcast %cst_35 : f32 to vector<8x32xf32>
    %96 = arith.addf %95, %94 : vector<8x32xf32>
    %97 = arith.divf %95, %96 : vector<8x32xf32>
    %98 = vector.extract_strided_slice %91 {offsets = [0, 32], sizes = [8, 32], strides = [1, 1]} : vector<8x128xf32> to vector<8x32xf32>
    %99 = arith.negf %98 : vector<8x32xf32>
    %100 = math.exp %99 : vector<8x32xf32>
    %cst_36 = arith.constant 1.000000e+00 : f32
    %101 = vector.broadcast %cst_36 : f32 to vector<8x32xf32>
    %102 = arith.addf %101, %100 : vector<8x32xf32>
    %103 = arith.divf %101, %102 : vector<8x32xf32>
    %104 = vector.extract_strided_slice %91 {offsets = [0, 64], sizes = [8, 32], strides = [1, 1]} : vector<8x128xf32> to vector<8x32xf32>
    %105 = math.tanh %104 : vector<8x32xf32>
    %106 = vector.extract_strided_slice %91 {offsets = [0, 96], sizes = [8, 32], strides = [1, 1]} : vector<8x128xf32> to vector<8x32xf32>
    %107 = arith.negf %106 : vector<8x32xf32>
    %108 = math.exp %107 : vector<8x32xf32>
    %cst_37 = arith.constant 1.000000e+00 : f32
    %109 = vector.broadcast %cst_37 : f32 to vector<8x32xf32>
    %110 = arith.addf %109, %108 : vector<8x32xf32>
    %111 = arith.divf %109, %110 : vector<8x32xf32>
    %112 = arith.mulf %103, %80 : vector<8x32xf32>
    %113 = arith.mulf %97, %105 : vector<8x32xf32>
    %114 = arith.addf %112, %113 : vector<8x32xf32>
    %115 = math.tanh %114 : vector<8x32xf32>
    %116 = arith.mulf %111, %115 : vector<8x32xf32>
    %117 = arith.index_cast %87 : i32 to index
    %c0_38 = arith.constant 0 : index
    %118 = vector.load %arg9[%117, %c0_38] : memref<64x32xf32, #tpu.memory_space<vmem>>, vector<8x32xf32>
    tpu.vector_store %arg9[%117, %c0_38], %116 {strides = array<i32>} : memref<64x32xf32, #tpu.memory_space<vmem>>, vector<8x32xf32>,
    %c4_i32 = arith.constant 4 : i32
    %c3_i32 = arith.constant 3 : i32
    %119 = arith.select %0, %c4_i32, %c3_i32 : i32
    %c8_i32_39 = arith.constant 8 : i32
    %120 = arith.muli %119, %c8_i32_39 : i32
    %121 = tpu.assume_multiple %120, 8 : i32
    %122 = arith.index_cast %121 : i32 to index
    %c0_40 = arith.constant 0 : index
    %123 = vector.load %arg8[%122, %c0_40] : memref<64x128xf32, #tpu.memory_space<vmem>>, vector<8x128xf32>
    %cst_41 = arith.constant dense<0.000000e+00> : vector<8x128xf32>
    %124 = tpu.matmul %116, %14, %cst_41 {dimension_numbers = #tpu.dot_dimension_numbers<[1], [0], [0], [1], [0, 0, 1, 1], [], []>} : vector<8x32xf32>, vector<32x128xf32>, vector<8x128xf32> -> vector<8x128xf32>
    %125 = arith.addf %123, %124 : vector<8x128xf32>
    %126 = vector.extract_strided_slice %125 {offsets = [0, 0], sizes = [8, 32], strides = [1, 1]} : vector<8x128xf32> to vector<8x32xf32>
    %127 = arith.negf %126 : vector<8x32xf32>
    %128 = math.exp %127 : vector<8x32xf32>
    %cst_42 = arith.constant 1.000000e+00 : f32
    %129 = vector.broadcast %cst_42 : f32 to vector<8x32xf32>
    %130 = arith.addf %129, %128 : vector<8x32xf32>
    %131 = arith.divf %129, %130 : vector<8x32xf32>
    %132 = vector.extract_strided_slice %125 {offsets = [0, 32], sizes = [8, 32], strides = [1, 1]} : vector<8x128xf32> to vector<8x32xf32>
    %133 = arith.negf %132 : vector<8x32xf32>
    %134 = math.exp %133 : vector<8x32xf32>
    %cst_43 = arith.constant 1.000000e+00 : f32
    %135 = vector.broadcast %cst_43 : f32 to vector<8x32xf32>
    %136 = arith.addf %135, %134 : vector<8x32xf32>
    %137 = arith.divf %135, %136 : vector<8x32xf32>
    %138 = vector.extract_strided_slice %125 {offsets = [0, 64], sizes = [8, 32], strides = [1, 1]} : vector<8x128xf32> to vector<8x32xf32>
    %139 = math.tanh %138 : vector<8x32xf32>
    %140 = vector.extract_strided_slice %125 {offsets = [0, 96], sizes = [8, 32], strides = [1, 1]} : vector<8x128xf32> to vector<8x32xf32>
    %141 = arith.negf %140 : vector<8x32xf32>
    %142 = math.exp %141 : vector<8x32xf32>
    %cst_44 = arith.constant 1.000000e+00 : f32
    %143 = vector.broadcast %cst_44 : f32 to vector<8x32xf32>
    %144 = arith.addf %143, %142 : vector<8x32xf32>
    %145 = arith.divf %143, %144 : vector<8x32xf32>
    %146 = arith.mulf %137, %114 : vector<8x32xf32>
    %147 = arith.mulf %131, %139 : vector<8x32xf32>
    %148 = arith.addf %146, %147 : vector<8x32xf32>
    %149 = math.tanh %148 : vector<8x32xf32>
    %150 = arith.mulf %145, %149 : vector<8x32xf32>
    %151 = arith.index_cast %121 : i32 to index
    %c0_45 = arith.constant 0 : index
    %152 = vector.load %arg9[%151, %c0_45] : memref<64x32xf32, #tpu.memory_space<vmem>>, vector<8x32xf32>
    tpu.vector_store %arg9[%151, %c0_45], %150 {strides = array<i32>} : memref<64x32xf32, #tpu.memory_space<vmem>>, vector<8x32xf32>,
    %c3_i32_46 = arith.constant 3 : i32
    %c4_i32_47 = arith.constant 4 : i32
    %153 = arith.select %0, %c3_i32_46, %c4_i32_47 : i32
    %c8_i32_48 = arith.constant 8 : i32
    %154 = arith.muli %153, %c8_i32_48 : i32
    %155 = tpu.assume_multiple %154, 8 : i32
    %156 = arith.index_cast %155 : i32 to index
    %c0_49 = arith.constant 0 : index
    %157 = vector.load %arg8[%156, %c0_49] : memref<64x128xf32, #tpu.memory_space<vmem>>, vector<8x128xf32>
    %cst_50 = arith.constant dense<0.000000e+00> : vector<8x128xf32>
    %158 = tpu.matmul %150, %14, %cst_50 {dimension_numbers = #tpu.dot_dimension_numbers<[1], [0], [0], [1], [0, 0, 1, 1], [], []>} : vector<8x32xf32>, vector<32x128xf32>, vector<8x128xf32> -> vector<8x128xf32>
    %159 = arith.addf %157, %158 : vector<8x128xf32>
    %160 = vector.extract_strided_slice %159 {offsets = [0, 0], sizes = [8, 32], strides = [1, 1]} : vector<8x128xf32> to vector<8x32xf32>
    %161 = arith.negf %160 : vector<8x32xf32>
    %162 = math.exp %161 : vector<8x32xf32>
    %cst_51 = arith.constant 1.000000e+00 : f32
    %163 = vector.broadcast %cst_51 : f32 to vector<8x32xf32>
    %164 = arith.addf %163, %162 : vector<8x32xf32>
    %165 = arith.divf %163, %164 : vector<8x32xf32>
    %166 = vector.extract_strided_slice %159 {offsets = [0, 32], sizes = [8, 32], strides = [1, 1]} : vector<8x128xf32> to vector<8x32xf32>
    %167 = arith.negf %166 : vector<8x32xf32>
    %168 = math.exp %167 : vector<8x32xf32>
    %cst_52 = arith.constant 1.000000e+00 : f32
    %169 = vector.broadcast %cst_52 : f32 to vector<8x32xf32>
    %170 = arith.addf %169, %168 : vector<8x32xf32>
    %171 = arith.divf %169, %170 : vector<8x32xf32>
    %172 = vector.extract_strided_slice %159 {offsets = [0, 64], sizes = [8, 32], strides = [1, 1]} : vector<8x128xf32> to vector<8x32xf32>
    %173 = math.tanh %172 : vector<8x32xf32>
    %174 = vector.extract_strided_slice %159 {offsets = [0, 96], sizes = [8, 32], strides = [1, 1]} : vector<8x128xf32> to vector<8x32xf32>
    %175 = arith.negf %174 : vector<8x32xf32>
    %176 = math.exp %175 : vector<8x32xf32>
    %cst_53 = arith.constant 1.000000e+00 : f32
    %177 = vector.broadcast %cst_53 : f32 to vector<8x32xf32>
    %178 = arith.addf %177, %176 : vector<8x32xf32>
    %179 = arith.divf %177, %178 : vector<8x32xf32>
    %180 = arith.mulf %171, %148 : vector<8x32xf32>
    %181 = arith.mulf %165, %173 : vector<8x32xf32>
    %182 = arith.addf %180, %181 : vector<8x32xf32>
    %183 = math.tanh %182 : vector<8x32xf32>
    %184 = arith.mulf %179, %183 : vector<8x32xf32>
    %185 = arith.index_cast %155 : i32 to index
    %c0_54 = arith.constant 0 : index
    %186 = vector.load %arg9[%185, %c0_54] : memref<64x32xf32, #tpu.memory_space<vmem>>, vector<8x32xf32>
    tpu.vector_store %arg9[%185, %c0_54], %184 {strides = array<i32>} : memref<64x32xf32, #tpu.memory_space<vmem>>, vector<8x32xf32>,
    %c2_i32_55 = arith.constant 2 : i32
    %c5_i32_56 = arith.constant 5 : i32
    %187 = arith.select %0, %c2_i32_55, %c5_i32_56 : i32
    %c8_i32_57 = arith.constant 8 : i32
    %188 = arith.muli %187, %c8_i32_57 : i32
    %189 = tpu.assume_multiple %188, 8 : i32
    %190 = arith.index_cast %189 : i32 to index
    %c0_58 = arith.constant 0 : index
    %191 = vector.load %arg8[%190, %c0_58] : memref<64x128xf32, #tpu.memory_space<vmem>>, vector<8x128xf32>
    %cst_59 = arith.constant dense<0.000000e+00> : vector<8x128xf32>
    %192 = tpu.matmul %184, %14, %cst_59 {dimension_numbers = #tpu.dot_dimension_numbers<[1], [0], [0], [1], [0, 0, 1, 1], [], []>} : vector<8x32xf32>, vector<32x128xf32>, vector<8x128xf32> -> vector<8x128xf32>
    %193 = arith.addf %191, %192 : vector<8x128xf32>
    %194 = vector.extract_strided_slice %193 {offsets = [0, 0], sizes = [8, 32], strides = [1, 1]} : vector<8x128xf32> to vector<8x32xf32>
    %195 = arith.negf %194 : vector<8x32xf32>
    %196 = math.exp %195 : vector<8x32xf32>
    %cst_60 = arith.constant 1.000000e+00 : f32
    %197 = vector.broadcast %cst_60 : f32 to vector<8x32xf32>
    %198 = arith.addf %197, %196 : vector<8x32xf32>
    %199 = arith.divf %197, %198 : vector<8x32xf32>
    %200 = vector.extract_strided_slice %193 {offsets = [0, 32], sizes = [8, 32], strides = [1, 1]} : vector<8x128xf32> to vector<8x32xf32>
    %201 = arith.negf %200 : vector<8x32xf32>
    %202 = math.exp %201 : vector<8x32xf32>
    %cst_61 = arith.constant 1.000000e+00 : f32
    %203 = vector.broadcast %cst_61 : f32 to vector<8x32xf32>
    %204 = arith.addf %203, %202 : vector<8x32xf32>
    %205 = arith.divf %203, %204 : vector<8x32xf32>
    %206 = vector.extract_strided_slice %193 {offsets = [0, 64], sizes = [8, 32], strides = [1, 1]} : vector<8x128xf32> to vector<8x32xf32>
    %207 = math.tanh %206 : vector<8x32xf32>
    %208 = vector.extract_strided_slice %193 {offsets = [0, 96], sizes = [8, 32], strides = [1, 1]} : vector<8x128xf32> to vector<8x32xf32>
    %209 = arith.negf %208 : vector<8x32xf32>
    %210 = math.exp %209 : vector<8x32xf32>
    %cst_62 = arith.constant 1.000000e+00 : f32
    %211 = vector.broadcast %cst_62 : f32 to vector<8x32xf32>
    %212 = arith.addf %211, %210 : vector<8x32xf32>
    %213 = arith.divf %211, %212 : vector<8x32xf32>
    %214 = arith.mulf %205, %182 : vector<8x32xf32>
    %215 = arith.mulf %199, %207 : vector<8x32xf32>
    %216 = arith.addf %214, %215 : vector<8x32xf32>
    %217 = math.tanh %216 : vector<8x32xf32>
    %218 = arith.mulf %213, %217 : vector<8x32xf32>
    %219 = arith.index_cast %189 : i32 to index
    %c0_63 = arith.constant 0 : index
    %220 = vector.load %arg9[%219, %c0_63] : memref<64x32xf32, #tpu.memory_space<vmem>>, vector<8x32xf32>
    tpu.vector_store %arg9[%219, %c0_63], %218 {strides = array<i32>} : memref<64x32xf32, #tpu.memory_space<vmem>>, vector<8x32xf32>,
    %c1_i32_64 = arith.constant 1 : i32
    %c6_i32_65 = arith.constant 6 : i32
    %221 = arith.select %0, %c1_i32_64, %c6_i32_65 : i32
    %c8_i32_66 = arith.constant 8 : i32
    %222 = arith.muli %221, %c8_i32_66 : i32
    %223 = tpu.assume_multiple %222, 8 : i32
    %224 = arith.index_cast %223 : i32 to index
    %c0_67 = arith.constant 0 : index
    %225 = vector.load %arg8[%224, %c0_67] : memref<64x128xf32, #tpu.memory_space<vmem>>, vector<8x128xf32>
    %cst_68 = arith.constant dense<0.000000e+00> : vector<8x128xf32>
    %226 = tpu.matmul %218, %14, %cst_68 {dimension_numbers = #tpu.dot_dimension_numbers<[1], [0], [0], [1], [0, 0, 1, 1], [], []>} : vector<8x32xf32>, vector<32x128xf32>, vector<8x128xf32> -> vector<8x128xf32>
    %227 = arith.addf %225, %226 : vector<8x128xf32>
    %228 = vector.extract_strided_slice %227 {offsets = [0, 0], sizes = [8, 32], strides = [1, 1]} : vector<8x128xf32> to vector<8x32xf32>
    %229 = arith.negf %228 : vector<8x32xf32>
    %230 = math.exp %229 : vector<8x32xf32>
    %cst_69 = arith.constant 1.000000e+00 : f32
    %231 = vector.broadcast %cst_69 : f32 to vector<8x32xf32>
    %232 = arith.addf %231, %230 : vector<8x32xf32>
    %233 = arith.divf %231, %232 : vector<8x32xf32>
    %234 = vector.extract_strided_slice %227 {offsets = [0, 32], sizes = [8, 32], strides = [1, 1]} : vector<8x128xf32> to vector<8x32xf32>
    %235 = arith.negf %234 : vector<8x32xf32>
    %236 = math.exp %235 : vector<8x32xf32>
    %cst_70 = arith.constant 1.000000e+00 : f32
    %237 = vector.broadcast %cst_70 : f32 to vector<8x32xf32>
    %238 = arith.addf %237, %236 : vector<8x32xf32>
    %239 = arith.divf %237, %238 : vector<8x32xf32>
    %240 = vector.extract_strided_slice %227 {offsets = [0, 64], sizes = [8, 32], strides = [1, 1]} : vector<8x128xf32> to vector<8x32xf32>
    %241 = math.tanh %240 : vector<8x32xf32>
    %242 = vector.extract_strided_slice %227 {offsets = [0, 96], sizes = [8, 32], strides = [1, 1]} : vector<8x128xf32> to vector<8x32xf32>
    %243 = arith.negf %242 : vector<8x32xf32>
    %244 = math.exp %243 : vector<8x32xf32>
    %cst_71 = arith.constant 1.000000e+00 : f32
    %245 = vector.broadcast %cst_71 : f32 to vector<8x32xf32>
    %246 = arith.addf %245, %244 : vector<8x32xf32>
    %247 = arith.divf %245, %246 : vector<8x32xf32>
    %248 = arith.mulf %239, %216 : vector<8x32xf32>
    %249 = arith.mulf %233, %241 : vector<8x32xf32>
    %250 = arith.addf %248, %249 : vector<8x32xf32>
    %251 = math.tanh %250 : vector<8x32xf32>
    %252 = arith.mulf %247, %251 : vector<8x32xf32>
    %253 = arith.index_cast %223 : i32 to index
    %c0_72 = arith.constant 0 : index
    %254 = vector.load %arg9[%253, %c0_72] : memref<64x32xf32, #tpu.memory_space<vmem>>, vector<8x32xf32>
    tpu.vector_store %arg9[%253, %c0_72], %252 {strides = array<i32>} : memref<64x32xf32, #tpu.memory_space<vmem>>, vector<8x32xf32>,
    %c0_i32_73 = arith.constant 0 : i32
    %c7_i32_74 = arith.constant 7 : i32
    %255 = arith.select %0, %c0_i32_73, %c7_i32_74 : i32
    %c8_i32_75 = arith.constant 8 : i32
    %256 = arith.muli %255, %c8_i32_75 : i32
    %257 = tpu.assume_multiple %256, 8 : i32
    %258 = arith.index_cast %257 : i32 to index
    %c0_76 = arith.constant 0 : index
    %259 = vector.load %arg8[%258, %c0_76] : memref<64x128xf32, #tpu.memory_space<vmem>>, vector<8x128xf32>
    %cst_77 = arith.constant dense<0.000000e+00> : vector<8x128xf32>
    %260 = tpu.matmul %252, %14, %cst_77 {dimension_numbers = #tpu.dot_dimension_numbers<[1], [0], [0], [1], [0, 0, 1, 1], [], []>} : vector<8x32xf32>, vector<32x128xf32>, vector<8x128xf32> -> vector<8x128xf32>
    %261 = arith.addf %259, %260 : vector<8x128xf32>
    %262 = vector.extract_strided_slice %261 {offsets = [0, 0], sizes = [8, 32], strides = [1, 1]} : vector<8x128xf32> to vector<8x32xf32>
    %263 = arith.negf %262 : vector<8x32xf32>
    %264 = math.exp %263 : vector<8x32xf32>
    %cst_78 = arith.constant 1.000000e+00 : f32
    %265 = vector.broadcast %cst_78 : f32 to vector<8x32xf32>
    %266 = arith.addf %265, %264 : vector<8x32xf32>
    %267 = arith.divf %265, %266 : vector<8x32xf32>
    %268 = vector.extract_strided_slice %261 {offsets = [0, 32], sizes = [8, 32], strides = [1, 1]} : vector<8x128xf32> to vector<8x32xf32>
    %269 = arith.negf %268 : vector<8x32xf32>
    %270 = math.exp %269 : vector<8x32xf32>
    %cst_79 = arith.constant 1.000000e+00 : f32
    %271 = vector.broadcast %cst_79 : f32 to vector<8x32xf32>
    %272 = arith.addf %271, %270 : vector<8x32xf32>
    %273 = arith.divf %271, %272 : vector<8x32xf32>
    %274 = vector.extract_strided_slice %261 {offsets = [0, 64], sizes = [8, 32], strides = [1, 1]} : vector<8x128xf32> to vector<8x32xf32>
    %275 = math.tanh %274 : vector<8x32xf32>
    %276 = vector.extract_strided_slice %261 {offsets = [0, 96], sizes = [8, 32], strides = [1, 1]} : vector<8x128xf32> to vector<8x32xf32>
    %277 = arith.negf %276 : vector<8x32xf32>
    %278 = math.exp %277 : vector<8x32xf32>
    %cst_80 = arith.constant 1.000000e+00 : f32
    %279 = vector.broadcast %cst_80 : f32 to vector<8x32xf32>
    %280 = arith.addf %279, %278 : vector<8x32xf32>
    %281 = arith.divf %279, %280 : vector<8x32xf32>
    %282 = arith.mulf %273, %250 : vector<8x32xf32>
    %283 = arith.mulf %267, %275 : vector<8x32xf32>
    %284 = arith.addf %282, %283 : vector<8x32xf32>
    %285 = math.tanh %284 : vector<8x32xf32>
    %286 = arith.mulf %281, %285 : vector<8x32xf32>
    %287 = arith.index_cast %257 : i32 to index
    %c0_81 = arith.constant 0 : index
    %288 = vector.load %arg9[%287, %c0_81] : memref<64x32xf32, #tpu.memory_space<vmem>>, vector<8x32xf32>
    tpu.vector_store %arg9[%287, %c0_81], %286 {strides = array<i32>} : memref<64x32xf32, #tpu.memory_space<vmem>>, vector<8x32xf32>,
    %c0_82 = arith.constant 0 : index
    %c0_83 = arith.constant 0 : index
    %289 = vector.load %arg10[%c0_82, %c0_83] : memref<8x32xf32, #tpu.memory_space<vmem>>, vector<8x32xf32>
    tpu.vector_store %arg10[%c0_82, %c0_83], %286 {strides = array<i32>} : memref<8x32xf32, #tpu.memory_space<vmem>>, vector<8x32xf32>,
    %c0_84 = arith.constant 0 : index
    %c0_85 = arith.constant 0 : index
    %290 = vector.load %arg11[%c0_84, %c0_85] : memref<8x32xf32, #tpu.memory_space<vmem>>, vector<8x32xf32>
    tpu.vector_store %arg11[%c0_84, %c0_85], %284 {strides = array<i32>} : memref<8x32xf32, #tpu.memory_space<vmem>>, vector<8x32xf32>,
    %c0_86 = arith.constant 0 : index
    %c0_87 = arith.constant 0 : index
    %291 = vector.load %arg9[%c0_86, %c0_87] : memref<64x32xf32, #tpu.memory_space<vmem>>, vector<64x32xf32>
    %c0_88 = arith.constant 0 : index
    %c0_89 = arith.constant 0 : index
    %c0_90 = arith.constant 0 : index
    %292 = vector.load %arg6[%c0_88, %c0_89, %c0_90] : memref<1x64x32xf32, #tpu.memory_space<vmem>>, vector<1x64x32xf32>
    %293 = vector.shape_cast %292 : vector<1x64x32xf32> to vector<64x32xf32>
    %294 = vector.shape_cast %291 : vector<64x32xf32> to vector<1x64x32xf32>
    tpu.vector_store %arg6[%c0_88, %c0_89, %c0_90], %294 {strides = array<i32>} : memref<1x64x32xf32, #tpu.memory_space<vmem>>, vector<1x64x32xf32>,
    %c0_i32_91 = arith.constant 0 : i32
    %295 = arith.cmpi eq, %arg1, %c0_i32_91 : i32
    %296 = arith.extui %295 : i1 to i32
    %c0_i32_92 = arith.constant 0 : i32
    %297 = arith.cmpi ne, %296, %c0_i32_92 : i32
    scf.if %297 {
      %c0_93 = arith.constant 0 : index
      %c0_94 = arith.constant 0 : index
      %c0_95 = arith.constant 0 : index
      %298 = vector.load %arg7[%c0_93, %c0_94, %c0_95] : memref<1x8x32xf32, #tpu.memory_space<vmem>>, vector<1x8x32xf32>
      %299 = vector.shape_cast %298 : vector<1x8x32xf32> to vector<8x32xf32>
      %300 = vector.shape_cast %286 : vector<8x32xf32> to vector<1x8x32xf32>
      tpu.vector_store %arg7[%c0_93, %c0_94, %c0_95], %300 {strides = array<i32>} : memref<1x8x32xf32, #tpu.memory_space<vmem>>, vector<1x8x32xf32>,
    } else {
    }
    return
  }
  func.func @transform_0(%arg0: i32, %arg1: i32) -> (i32, i32) {
    %c2_i32 = arith.constant 2 : i32
    %0 = arith.muli %c2_i32, %arg1 : i32
    %c0_i32 = arith.constant 0 : i32
    %1 = arith.subi %c0_i32, %0 : i32
    %2 = arith.muli %arg0, %1 : i32
    %3 = arith.addi %arg1, %2 : i32
    %c0_i32_0 = arith.constant 0 : i32
    %c0_i32_1 = arith.constant 0 : i32
    return %3, %c0_i32_0 : i32, i32
  }
  func.func @transform_1(%arg0: i32, %arg1: i32) -> (i32, i32, i32) {
    %c0_i32 = arith.constant 0 : i32
    %c0_i32_0 = arith.constant 0 : i32
    %c0_i32_1 = arith.constant 0 : i32
    return %arg0, %c0_i32, %c0_i32_0 : i32, i32, i32
  }
  func.func @transform_2(%arg0: i32, %arg1: i32) -> (i32, i32, i32) {
    %c0_i32 = arith.constant 0 : i32
    %c0_i32_0 = arith.constant 0 : i32
    %c0_i32_1 = arith.constant 0 : i32
    return %arg0, %c0_i32, %c0_i32_0 : i32, i32, i32
  }
  func.func @transform_3(%arg0: i32, %arg1: i32) -> (i32, i32, i32) {
    %c0_i32 = arith.constant 0 : i32
    %c0_i32_0 = arith.constant 0 : i32
    %c0_i32_1 = arith.constant 0 : i32
    return %arg0, %c0_i32, %c0_i32_0 : i32, i32, i32
  }
  func.func @transform_4(%arg0: i32, %arg1: i32) -> (i32, i32, i32) {
    %c2_i32 = arith.constant 2 : i32
    %0 = arith.muli %c2_i32, %arg1 : i32
    %c0_i32 = arith.constant 0 : i32
    %1 = arith.subi %c0_i32, %0 : i32
    %2 = arith.muli %arg0, %1 : i32
    %3 = arith.addi %arg1, %2 : i32
    %c0_i32_0 = arith.constant 0 : i32
    %c0_i32_1 = arith.constant 0 : i32
    return %arg0, %3, %c0_i32_0 : i32, i32, i32
  }
  func.func @transform_5(%arg0: i32, %arg1: i32) -> (i32, i32, i32) {
    %c0_i32 = arith.constant 0 : i32
    %c0_i32_0 = arith.constant 0 : i32
    %c0_i32_1 = arith.constant 0 : i32
    return %arg0, %c0_i32, %c0_i32_0 : i32, i32, i32
  }
}

</mosaic_0001>

<bundles_post_ra>
// kernel: tpu_custom_call.1
= control target key start
LH: loop header
LB: loop body
LE: loop exit
PB: predicated region body
PF: predicated region fallthrough
CT: control target
= control target key end

     0   :  { %11 = vsyncpa [#allocation7], 0  ;;  %s2008_s0 = inlined_call_operand.vmem [shape: f32[64,16], index: 0, kind: input, shape index: {}]   ;;  %s2009_s1 = inlined_call_operand.hbm [shape: f32[2,16,128], index: 1, kind: input, shape index: {}]   ;;  %s2010_s2 = inlined_call_operand.vmem [shape: f32[2,32,128], index: 2, kind: input, shape index: {}]   ;;  %s2011_s3 = inlined_call_operand.vmem [shape: f32[2,1,128], index: 3, kind: input, shape index: {}]   ;;  %s2012_s4 = inlined_call_operand.vmem [shape: f32[2,64,32], index: 4, kind: output, shape index: {0}]   ;;  %s2013_s5 = inlined_call_operand.hbm [shape: f32[2,8,32], index: 5, kind: output, shape index: {1}]  }
   0x1   :  { %13 = vsyncpa [#allocation7 + $0x1], 0 }
   0x2   :  { %14 = vsyncpa [#allocation8], 0 }
   0x3   :  { %16 = vsyncpa [#allocation8 + $0x1], 0  ;;  %s1639_s18 = smov 0   ;;  %s1641_s19 = smov 0  }
   0x4   :  { %s1643_s20 = smov 0   ;;  %s1645_s21 = smov 0  }
   0x5   :  { %s1647_s22 = smov 0   ;;  %s1649_s23 = smov 0  }
   0x6 LB: > { %s1300_s24 = sadd.s32 4294967295, %s1601_s23   ;;  %s1301_s25 = sadd.s32 4294967294, %s1601_s23   ;;  %s1601_s23 = sphi %s1649_s23, %s22_s23   ;;  %s1597_s22 = sphi %s1647_s22, %s2022_s22   ;;  %s1593_s21 = sphi %s1645_s21, %s2021_s21   ;;  %s1589_s20 = sphi %s1643_s20, %s2020_s20   ;;  %s1585_s19 = sphi %s1641_s19, %s2019_s19   ;;  %s1581_s18 = sphi %s1639_s18, %s2018_s18  }
   0x7   : > { %s34_s26 = sadd.s32 1, %s1597_s22  ;;  %s75_s27 = sadd.s32 1, %s1589_s20 }
   0x8   : > { %p36_p0 = scmp.ge.s32.totalorder %s34_s26, 2  ;;  %p82_p1 = scmp.ne.s32.totalorder %s1589_s20, %s1585_s19 }
   0x9   : > { %p83_p2 = scmp.eq.s32.totalorder %s1601_s23, 0  ;;  %p88_p3 = scmp.ne.s32.totalorder %s1585_s19, %s1581_s18 }
   0xa   : > { %s2024_s26 = smov (%p36_p0, %s34_s26), 0  ;;  %p89_p5 = scmp.eq.s32.totalorder %s1300_s24, 0 }
   0xb   : > { %p1680_p4 = por %p83_p2, %p82_p1  ;;  %s72_s29 = ssub.s32 %s1597_s22, %s2024_s26 }
   0xc   : > { %p200_p6 = scmp.eq.s32.totalorder %s1300_s24, 1  ;;  %p73_p7 = scmp.eq.s32.totalorder %s72_s29, 0 }
   0xd   : > { %p1686_p8 = por %p89_p5, %p88_p3  ;;  %p206_p10 = scmp.eq.s32.totalorder %s1301_s25, 1 }
   0xe   : > { %p1690_p9 = por %p200_p6, %p82_p1  ;;  %p1303_p12 = scmp.ge.s32.totalorder %s1601_s23, 2 }
   0xf   : > { %s1695_s7 = scalar_select %p73_p7, %s1589_s20, %s75_s27  }
  0x10   : > { %p1697_p11 = por %p206_p10, %p88_p3  ;;  %p1368_p13 = scmp.lt.s32.totalorder %s1601_s23, 2 }
  0x11   : > { %s243_s9 = sand.u32 1, %s1589_s20   ;;  %s1351_s11 = sshll.u32 %s1597_s22, 4 }
  0x12   : > { %s1305_s10 = sshll.u32 %s243_s9, 4  ;;  %s252_s14 = scalar_lea.hbm %s2009_s1, %s1351_s11 }
  0x13   : > { %s247_s15 = scalar_lea.vmem [#allocation6], %s1305_s10  ;;  %s253_s17 = sshll.u32 %s252_s14, 4  ;;  %s254_s17 = int_to_ptr.hbm [resolvable:$true] %s253_s17 }
  0x14   : > { %s255_s16 = sshll.u32 %s247_s15, 4  ;;  %p1361_p0 = pnand %p1368_p13, %p1680_p4  ;;  %s256_s16 = int_to_ptr.vmem [resolvable:$true] %s255_s16 }
  0x15   : > { %p1308_p1 = scmp.ge.s32.totalorder %s1601_s23, 1  ;;  %s244_s24 = scalar_lea.sflag [#allocation7], %s243_s9 }
  0x16   : > { %s1603_s25 = smov 128   ;;  %s1604_s27 = smov 8  }
  0x17   : > { %1363 = dma.hbm_to_vmem [thread:$0]  (!%p1361_p0), %s254_s17, 256, %s256_s16, %s244_s24, %s1603_s25, %s1603_s25, %s1604_s27  }
  0x18   : > { %p277_p2 = scmp.lt.s32.totalorder %s1601_s23, 3 }
  0x1a   : > { %p278_p3 = pnand %p1308_p1, %p277_p2 }
  0x1b   : > { %s1713_s29 = sand.u32 (!%p278_p3), 1, %s1585_s19  }
  0x1c   : > { %281 = sbr.rel (%p278_p3) target bundleno = 4712 (0x1268), region = 36  ;;  %s1309_s10 = sshll.u32 (!%p278_p3), %s1713_s29, 4 }
  0x1d   : > { %s284_s11 = scalar_lea.sflag (!%p278_p3), [#allocation7], %s1713_s29  ;;  %s287_s12 = scalar_lea.vmem (!%p278_p3), [#allocation6], %s1309_s10 }
  0x21   : > { %1572 = dma.done.wait (%p1686_p8), %s284_s11, 256  }
  0x22   : > { %1574 = vsyncadd (%p1686_p8), %s284_s11, 4294967040  ;;  %p359_p4 = scmp.lt.s32.totalorder %s1593_s21, 1  ;;  %vm390_vm0 = vcmask 261120   ;;  %v1605_v0 = vmov 0.0   ;;  %v402_v1 = vld [vmem:[%s287_s12 + $0x8] sm:$0xff]  ;;  %v401_v2 = vld [vmem:[%s287_s12] sm:$0xff] }
  0x23   : > { %391 = vst.msk [vmem:[#allocation4] sm:$0xff] %vm390_vm0, %v1605_v0  ;;  %446 = vmatpush.msra.mxu0 %v402_v1  ;;  %1354 = vmatpush.msra.mxu3 %v402_v1  ;;  %v393_v3 = vld [vmem:[%s2008_s0] sm:$0xff]  ;;  %vm407_vm1 = vcmask 130048   ;;  %v398_v4 = vld [vmem:[%s2008_s0 + $0x28] sm:$0xff]  ;;  %v399_v10 = vld [vmem:[%s2008_s0 + $0x30] sm:$0xff]  ;;  %p385_p5 = scmp.eq.s32.totalorder %s1593_s21, 1 }
  0x24   : > { %s1724_s28 = scalar_select %p359_p4, %s1593_s21, 1  ;;  %392 = vst.msk [vmem:[#allocation5] sm:$0xff] %vm390_vm0, %v1605_v0  ;;  %v394_v9 = vld [vmem:[%s2008_s0 + $0x8] sm:$0xff]  ;;  %v395_v12 = vld [vmem:[%s2008_s0 + $0x10] sm:$0xff]  ;;  %v400_v13 = vld [vmem:[%s2008_s0 + $0x38] sm:$0xff] }
  0x25   : > { %447 = vmatpush.msra.mxu0 %v401_v2  ;;  %1355 = vmatpush.msra.mxu3 %v401_v2  ;;  %s1811_s25 = scalar_select %p385_p5, 7, 0 }
  0x26   : > { %s1352_s9 = sshll.u32 %s1724_s28, 5  ;;  %s366_s10 = scalar_lea.vmem %s2011_s3, %s1724_s28  ;;  %1315 = vmatmul.msk.f32.vlgmr.msra.gmra.mxu0 %vm407_vm1, %v393_v3  ;;  %1320 = vmatmul.msk.f32.vlgmr.msra.gmra.mxu3 %vm407_vm1, %v398_v4 }
  0x27   : > { %s363_s30 = scalar_lea.vmem %s2010_s2, %s1352_s9  ;;  %v1801_v14 = vld [vmem:[%s366_s10] ss:$0 sm:$0xff]  ;;  %s1323_s27 = sshll.u32 %s1811_s25, 3 }
  0x28   : > { %v1741_v5 = vld [vmem:[%s363_s30 + $0x18] sm:$0xff]  ;;  %v1745_v6 = vld [vmem:[%s363_s30 + $0x10] sm:$0xff]  ;;  %v1749_v7 = vld [vmem:[%s363_s30 + $0x8] sm:$0xff]  ;;  %s489_s10 = scalar_lea.vmem [#allocation2], %s1323_s27  ;;  %s1606_s11 = smov 64  }
  0x29   : > { %507 = vmatpush.msra.mxu1 %v1741_v5  ;;  %581 = vmatpush.msra.mxu2 %v1741_v5  ;;  %v1754_v8 = vld [vmem:[%s363_s30] sm:$0xff]  ;;  %s1607_s12 = smov 32   ;;  %s561_s9 = scalar_lea.vmem [#allocation3], %s1323_s27 }
  0x2a   : > { %651 = vmatpush.msrb.mxu3 %v1741_v5  ;;  %v485_v11 = vld [vmem:[#allocation4] sm:$0xff]  ;;  %s1832_s13 = scalar_select %p385_p5, 6, 1 }
  0x2b   : > { %508 = vmatpush.msra.mxu1 %v1745_v6  ;;  %582 = vmatpush.msra.mxu2 %v1745_v6  ;;  %v486_v31 = vld [vmem:[#allocation5] sm:$0xff]  ;;  %s1847_s16 = scalar_select %p385_p5, 5, 2 }
  0x2c   : > { %652 = vmatpush.msrb.mxu3 %v1745_v6  ;;  %s1326_s14 = sshll.u32 %s1832_s13, 3 }
  0x2d   : > { %509 = vmatpush.msra.mxu1 %v1749_v7  ;;  %583 = vmatpush.msra.mxu2 %v1749_v7  ;;  %s565_s30 = scalar_lea.vmem [#allocation2], %s1326_s14  ;;  %s631_s15 = scalar_lea.vmem [#allocation3], %s1326_s14 }
  0x2e   : > { %653 = vmatpush.msrb.mxu3 %v1749_v7  ;;  %1316 = vmatmul.msk.f32.gmra.mxu0 %vm407_vm1, %v394_v9  ;;  %s1329_s17 = sshll.u32 %s1847_s16, 3 }
  0x2f   : > { %510 = vmatpush.msra.mxu1 %v1754_v8  ;;  %584 = vmatpush.msra.mxu2 %v1754_v8  ;;  %s635_s24 = scalar_lea.vmem [#allocation2], %s1329_s17  ;;  %s701_s13 = scalar_lea.vmem [#allocation3], %s1329_s17 }
  0x30   : > { %1321 = vmatmul.msk.f32.gmra.mxu3 %vm407_vm1, %v399_v10  ;;  %1324 = vmatmul.msk.f32.vlgmr.msra.gmra.mxu1 %vm390_vm0, %v485_v11  ;;  %s1872_s14 = scalar_select %p385_p5, 4, 3 }
  0x31   : > { %654 = vmatpush.msrb.mxu3 %v1754_v8  ;;  %721 = vmatpush.msrb.mxu1 %v1741_v5  ;;  %s1887_s17 = scalar_select %p385_p5, 3, 4 }
  0x32   : > { %791 = vmatpush.msrb.mxu2 %v1741_v5 }
  0x33   : > { %861 = vmatpush.msra.mxu3 %v1741_v5  ;;  %722 = vmatpush.msrb.mxu1 %v1745_v6 }
  0x34   : > { %792 = vmatpush.msrb.mxu2 %v1745_v6 }
  0x35   : > { %862 = vmatpush.msra.mxu3 %v1745_v6  ;;  %723 = vmatpush.msrb.mxu1 %v1749_v7 }
  0x36   : > { %793 = vmatpush.msrb.mxu2 %v1749_v7  ;;  %1317 = vmatmul.msk.f32.gmra.mxu0 %vm407_vm1, %v395_v12 }
  0x37   : > { %863 = vmatpush.msra.mxu3 %v1749_v7  ;;  %724 = vmatpush.msrb.mxu1 %v1754_v8 }
  0x38   : > { %1322 = vmatmul.msk.f32.gmra.mxu3 %vm407_vm1, %v400_v13  ;;  %794 = vmatpush.msrb.mxu2 %v1754_v8 }
  0x39   : > { %864 = vmatpush.msra.mxu3 %v1754_v8  ;;  %931 = vmatpush.msra.mxu1 %v1741_v5 }
  0x3b   : > { %932 = vmatpush.msra.mxu1 %v1745_v6 }
  0x3d   : > { %933 = vmatpush.msra.mxu1 %v1749_v7 }
  0x3f   : > { %934 = vmatpush.msra.mxu1 %v1754_v8 }
  0xa3   : > { %v449_v15 = vpop.f32.mrf.mxu0 }
  0xa4   : > { %v450_v16 = vadd.f32 %v1801_v14, %v449_v15 }
  0xa6   : > { %473 = vst [vmem:[#allocation2] sm:$0xff] %v450_v16 }
  0xa9   : > { %v464_v17 = vpop.f32.mrf.mxu3 }
  0xaa   : > { %v465_v18 = vadd.f32 %v1801_v14, %v464_v17 }
  0xab   : > { %v452_v19 = vpop.f32.mrf.mxu0 }
  0xac   : > { %478 = vst [vmem:[#allocation2 + $0x28] sm:$0xff] %v465_v18  ;;  %v453_v20 = vadd.f32 %v1801_v14, %v452_v19 }
  0xad   : > { %v512_v27 = vpop.f32.mrf.mxu1 }
  0xae   : > { %474 = vst [vmem:[#allocation2 + $0x8] sm:$0xff] %v453_v20 }
  0xb3   : > { %v467_v21 = vpop.f32.mrf.mxu3  ;;  %v455_v23 = vpop.f32.mrf.mxu0 }
  0xb4   : > { %v468_v22 = vadd.f32 %v1801_v14, %v467_v21  ;;  %v456_v24 = vadd.f32 %v1801_v14, %v455_v23 }
  0xb6   : > { %479 = vst [vmem:[#allocation2 + $0x30] sm:$0xff] %v468_v22 }
  0xb7   : > { %475 = vst [vmem:[#allocation2 + $0x10] sm:$0xff] %v456_v24 }
  0xbb   : > { %v470_v25 = vpop.f32.mrf.mxu3 }
  0xbc   : > { %v471_v26 = vadd.f32 %v1801_v14, %v470_v25 }
  0xbe   : > { %480 = vst [vmem:[#allocation2 + $0x38] sm:$0xff] %v471_v26 }
  0xc5   : > { %v490_v28 = vld [vmem:[%s489_s10] sm:$0xff]  ;;  %s1353_s10 = sshll.u32 %s1724_s28, 6 }
  0xc6   : > { %v515_v29 = vadd.f32 %v512_v27, %v490_v28  ;;  %v566_v55 = vld [vmem:[%s565_s30] sm:$0xff]  ;;  %s1332_s30 = sshll.u32 %s1872_s14, 3  ;;  %s1904_s14 = scalar_lea.vmem %s2012_s4, %s1353_s10 }
  0xc7   : > { %v636_v18 = vld [vmem:[%s635_s24] sm:$0xff]  ;;  %s771_s16 = scalar_lea.vmem [#allocation3], %s1332_s30  ;;  %s1335_s24 = sshll.u32 %s1887_s17, 3 }
  0xc8   : > { %1425 = vtanh.f32 %v515_v29  ;;  %v1325_v32 = vmul.f32 -1.442695, %v515_v29  ;;  %s775_s25 = scalar_lea.vmem [#allocation2], %s1335_s24  ;;  %s841_s27 = scalar_lea.vmem [#allocation3], %s1335_s24 }
  0xc9   : > { %s1931_s17 = scalar_select %p385_p5, 1, 6 }
  0xca   : > { %1427 = vpow2.f32 %v1325_v32  ;;  %s1950_s10 = scalar_select %p385_p5, 0, 7 }
  0xcb   : > { %s1341_s24 = sshll.u32 %s1931_s17, 3 }
  0xce   : > { %v1426_v30 = vpop.eup %1425 }
  0xcf   : > { %542 = vrot.lane.b32.xlu0 %v1426_v30, %s1606_s11 }
  0xd0   : > { %v1428_v33 = vpop.eup %1427 }
  0xd1   : > { %v519_v34 = vadd.f32 1.0, %v1428_v33 }
  0xd3   : > { %1429 = vrcp.f32 %v519_v34  ;;  %v531_v40 = vand.u32 2147483648, %v519_v34  ;;  %vm525_vm3 = vweird.f32 %v519_v34  ;;  %v529_v41 = vand.u32 2147483647, %v519_v34 }
  0xd5   : > { %v532_v43 = vor.u32 1.1754944e-38, %v531_v40  ;;  %vm530_vm5 = vcmp.eq.f32.partialorder %v529_v41, 8.507059e+37  ;;  %v396_v41 = vld [vmem:[%s2008_s0 + $0x18] sm:$0xff] }
  0xd6   : > { %1318 = vmatmul.msk.f32.gmra.mxu0 %vm407_vm1, %v396_v41 }
  0xd7   : > { %537 = vrot.lane.b32.xlu0 %v486_v31, %s1607_s12 }
  0xd9   : > { %v1430_v35 = vpop.eup %1429 }
  0xda   : > { %v521_v36 = vmul.f32 %v1430_v35, %v519_v34  ;;  %vm526_vm2 = vweird.f32 %v1430_v35 }
  0xdb   : > { %vm527_vm4 = vmor %vm525_vm3, %vm526_vm2 }
  0xdc   : > { %v522_v37 = vsub.f32 1.0, %v521_v36 }
  0xde   : > { %v523_v38 = vmul.f32 %v1430_v35, %v522_v37 }
  0xe0   : > { %v524_v39 = vadd.f32 %v1430_v35, %v523_v38 }
  0xe2   : > { %v528_v42 = vsel %vm527_vm4, %v1430_v35, %v524_v39 }
  0xe3   : > { %v533_v45 = vsel %vm530_vm5, %v532_v43, %v528_v42  ;;  %v397_v42 = vld [vmem:[%s2008_s0 + $0x20] sm:$0xff] }
  0xe4   : > { %1319 = vmatmul.msk.f32.gmra.mxu0 %vm407_vm1, %v397_v42 }
 0x141   : > { %v543_v44 = vpop.permute.xlu0 %542 }
 0x142   : > { %v545_v46 = vmul.f32 %v543_v44, %v533_v45 }
 0x144   : > { %547 = vrot.lane.b32.xlu1 %v545_v46, %s1607_s12 }
 0x149   : > { %v538_v47 = vpop.permute.xlu0 %537 }
 0x14a   : > { %v540_v48 = vmul.f32 %v538_v47, %v533_v45 }
 0x1b6   : > { %v548_v49 = vpop.permute.xlu1 %547 }
 0x1b7   : > { %v550_v50 = vadd.f32 %v548_v49, %v540_v48 }
 0x1b9   : > { %1431 = vtanh.f32 %v550_v50 }
 0x1bf   : > { %v1432_v51 = vpop.eup %1431 }
 0x1c0   : > { %553 = vrot.lane.b32.xlu1 %v1432_v51, %s1606_s11 }
 0x232   : > { %v554_v52 = vpop.permute.xlu1 %553 }
 0x233   : > { %v556_v53 = vmul.f32 %v554_v52, %v533_v45  ;;  %v458_v45 = vpop.f32.mrf.mxu0 }
 0x234   : > { %v459_v46 = vadd.f32 %v1801_v14, %v458_v45 }
 0x235   : > { %558 = vrot.lane.b32.xlu2 %v556_v53, %s1607_s12 }
 0x236   : > { %476 = vst [vmem:[#allocation2 + $0x18] sm:$0xff] %v459_v46 }
 0x23b   : > { %v461_v47 = vpop.f32.mrf.mxu0 }
 0x23c   : > { %v462_v48 = vadd.f32 %v1801_v14, %v461_v47 }
 0x23e   : > { %477 = vst [vmem:[#allocation2 + $0x20] sm:$0xff] %v462_v48 }
 0x28f   : > { %v559_v54 = vpop.permute.xlu2 %558 }
 0x290   : > { %562 = vst.msk [vmem:[%s561_s9] sm:$0xff] %vm390_vm0, %v559_v54  ;;  %1327 = vmatmul.msk.f32.vlgmr.msra.gmra.mxu2 %vm390_vm0, %v559_v54  ;;  %s1344_s9 = sshll.u32 %s1950_s10, 3  ;;  %s1539_s10 = scalar_lea.hbm %s2013_s5, 16 }
 0x291   : > { %1001 = vmatpush.msra.mxu2 %v1741_v5 }
 0x293   : > { %1002 = vmatpush.msra.mxu2 %v1745_v6 }
 0x295   : > { %1003 = vmatpush.msra.mxu2 %v1749_v7 }
 0x297   : > { %1004 = vmatpush.msra.mxu2 %v1754_v8 }
 0x313   : > { %v586_v56 = vpop.f32.mrf.mxu2 }
 0x314   : > { %v589_v57 = vadd.f32 %v586_v56, %v566_v55 }
 0x316   : > { %1433 = vtanh.f32 %v589_v57  ;;  %v1328_v59 = vmul.f32 -1.442695, %v589_v57 }
 0x318   : > { %1435 = vpow2.f32 %v1328_v59 }
 0x31c   : > { %v1434_v58 = vpop.eup %1433 }
 0x31d   : > { %612 = vrot.lane.b32.xlu2 %v1434_v58, %s1606_s11 }
 0x31e   : > { %v1436_v60 = vpop.eup %1435 }
 0x31f   : > { %v593_v61 = vadd.f32 1.0, %v1436_v60 }
 0x321   : > { %1437 = vrcp.f32 %v593_v61  ;;  %v605_v3 = vand.u32 2147483648, %v593_v61  ;;  %vm599_vm7 = vweird.f32 %v593_v61  ;;  %v603_v4 = vand.u32 2147483647, %v593_v61 }
 0x323   : > { %v606_v6 = vor.u32 1.1754944e-38, %v605_v3  ;;  %vm604_vm9 = vcmp.eq.f32.partialorder %v603_v4, 8.507059e+37 }
 0x327   : > { %v1438_v62 = vpop.eup %1437 }
 0x328   : > { %v595_v63 = vmul.f32 %v1438_v62, %v593_v61  ;;  %vm600_vm6 = vweird.f32 %v1438_v62 }
 0x329   : > { %vm601_vm8 = vmor %vm599_vm7, %vm600_vm6 }
 0x32a   : > { %v596_v0 = vsub.f32 1.0, %v595_v63 }
 0x32c   : > { %v597_v1 = vmul.f32 %v1438_v62, %v596_v0 }
 0x32e   : > { %v598_v2 = vadd.f32 %v1438_v62, %v597_v1 }
 0x330   : > { %v602_v5 = vsel %vm601_vm8, %v1438_v62, %v598_v2 }
 0x331   : > { %v607_v8 = vsel %vm604_vm9, %v606_v6, %v602_v5 }
 0x332   : > { %v610_v10 = vmul.f32 %v607_v8, %v550_v50 }
 0x377   : > { %v613_v7 = vpop.permute.xlu2 %612 }
 0x378   : > { %v615_v9 = vmul.f32 %v613_v7, %v607_v8 }
 0x37a   : > { %617 = vrot.lane.b32.xlu0 %v615_v9, %s1607_s12 }
 0x3ec   : > { %v618_v11 = vpop.permute.xlu0 %617 }
 0x3ed   : > { %v620_v12 = vadd.f32 %v618_v11, %v610_v10  ;;  %v776_v11 = vld [vmem:[%s775_s25] sm:$0xff]  ;;  %s915_s25 = scalar_lea.vmem [#allocation2], %s1341_s24 }
 0x3ef   : > { %1439 = vtanh.f32 %v620_v12 }
 0x3f5   : > { %v1440_v13 = vpop.eup %1439 }
 0x3f6   : > { %623 = vrot.lane.b32.xlu1 %v1440_v13, %s1606_s11 }
 0x468   : > { %v624_v15 = vpop.permute.xlu1 %623 }
 0x469   : > { %v626_v16 = vmul.f32 %v624_v15, %v607_v8 }
 0x46b   : > { %628 = vrot.lane.b32.xlu2 %v626_v16, %s1607_s12 }
 0x4c5   : > { %v629_v17 = vpop.permute.xlu2 %628 }
 0x4c6   : > { %632 = vst.msk [vmem:[%s631_s15] sm:$0xff] %vm390_vm0, %v629_v17  ;;  %1330 = vmatmul.msk.f32.vlgmr.msrb.gmra.mxu3 %vm390_vm0, %v629_v17  ;;  %s705_s15 = scalar_lea.vmem [#allocation2], %s1332_s30 }
 0x4c7   : > { %v706_v50 = vld [vmem:[%s705_s15] sm:$0xff]  ;;  %s1912_s30 = scalar_select %p385_p5, 2, 5 }
 0x4c9   : > { %s1338_s15 = sshll.u32 %s1912_s30, 3  ;;  %s1608_s30 = smov 96  }
 0x4ca   : > { %s845_s28 = scalar_lea.vmem [#allocation2], %s1338_s15 }
 0x549   : > { %v656_v19 = vpop.f32.mrf.mxu3 }
 0x54a   : > { %v659_v20 = vadd.f32 %v656_v19, %v636_v18 }
 0x54c   : > { %1441 = vtanh.f32 %v659_v20  ;;  %v1331_v22 = vmul.f32 -1.442695, %v659_v20 }
 0x54e   : > { %1443 = vpow2.f32 %v1331_v22 }
 0x552   : > { %v1442_v21 = vpop.eup %1441 }
 0x553   : > { %682 = vrot.lane.b32.xlu0 %v1442_v21, %s1606_s11 }
 0x554   : > { %v1444_v23 = vpop.eup %1443 }
 0x555   : > { %v663_v24 = vadd.f32 1.0, %v1444_v23 }
 0x557   : > { %1445 = vrcp.f32 %v663_v24  ;;  %v675_v30 = vand.u32 2147483648, %v663_v24  ;;  %vm669_vm11 = vweird.f32 %v663_v24  ;;  %v673_v31 = vand.u32 2147483647, %v663_v24 }
 0x559   : > { %v676_v33 = vor.u32 1.1754944e-38, %v675_v30  ;;  %vm674_vm13 = vcmp.eq.f32.partialorder %v673_v31, 8.507059e+37 }
 0x55d   : > { %v1446_v25 = vpop.eup %1445 }
 0x55e   : > { %v665_v26 = vmul.f32 %v1446_v25, %v663_v24  ;;  %vm670_vm10 = vweird.f32 %v1446_v25 }
 0x55f   : > { %vm671_vm12 = vmor %vm669_vm11, %vm670_vm10 }
 0x560   : > { %v666_v27 = vsub.f32 1.0, %v665_v26 }
 0x562   : > { %v667_v28 = vmul.f32 %v1446_v25, %v666_v27 }
 0x564   : > { %v668_v29 = vadd.f32 %v1446_v25, %v667_v28 }
 0x566   : > { %v672_v32 = vsel %vm671_vm12, %v1446_v25, %v668_v29 }
 0x567   : > { %v677_v35 = vsel %vm674_vm13, %v676_v33, %v672_v32 }
 0x568   : > { %v680_v37 = vmul.f32 %v677_v35, %v620_v12 }
 0x5c5   : > { %v683_v34 = vpop.permute.xlu0 %682 }
 0x5c6   : > { %v685_v36 = vmul.f32 %v683_v34, %v677_v35 }
 0x5c8   : > { %687 = vrot.lane.b32.xlu1 %v685_v36, %s1607_s12 }
 0x63a   : > { %v688_v38 = vpop.permute.xlu1 %687 }
 0x63b   : > { %v690_v39 = vadd.f32 %v688_v38, %v680_v37 }
 0x63d   : > { %1447 = vtanh.f32 %v690_v39 }
 0x643   : > { %v1448_v40 = vpop.eup %1447 }
 0x644   : > { %693 = vrot.lane.b32.xlu2 %v1448_v40, %s1606_s11  ;;  %v846_v40 = vld [vmem:[%s845_s28] sm:$0xff]  ;;  %s1310_s28 = sshll.u32 %s1713_s29, 3 }
 0x69e   : > { %v694_v43 = vpop.permute.xlu2 %693 }
 0x69f   : > { %v696_v44 = vmul.f32 %v694_v43, %v677_v35 }
 0x6a1   : > { %698 = vrot.lane.b32.xlu0 %v696_v44, %s1607_s12 }
 0x713   : > { %v699_v49 = vpop.permute.xlu0 %698 }
 0x714   : > { %702 = vst.msk [vmem:[%s701_s13] sm:$0xff] %vm390_vm0, %v699_v49  ;;  %1333 = vmatmul.msk.f32.vlgmr.msrb.gmra.mxu1 %vm390_vm0, %v699_v49  ;;  %s985_s13 = scalar_lea.vmem [#allocation2], %s1344_s9 }
 0x791   : > { %v726_v51 = vpop.f32.mrf.mxu1 }
 0x792   : > { %v729_v52 = vadd.f32 %v726_v51, %v706_v50 }
 0x794   : > { %1449 = vtanh.f32 %v729_v52  ;;  %v1334_v53 = vmul.f32 -1.442695, %v729_v52 }
 0x796   : > { %1451 = vpow2.f32 %v1334_v53 }
 0x79a   : > { %v1450_v14 = vpop.eup %1449 }
 0x79b   : > { %752 = vrot.lane.b32.xlu1 %v1450_v14, %s1606_s11 }
 0x79c   : > { %v1452_v54 = vpop.eup %1451 }
 0x79d   : > { %v733_v55 = vadd.f32 1.0, %v1452_v54 }
 0x79f   : > { %1453 = vrcp.f32 %v733_v55  ;;  %v745_v61 = vand.u32 2147483648, %v733_v55  ;;  %vm739_vm15 = vweird.f32 %v733_v55  ;;  %v743_v62 = vand.u32 2147483647, %v733_v55 }
 0x7a1   : > { %v746_v0 = vor.u32 1.1754944e-38, %v745_v61  ;;  %vm744_vm2 = vcmp.eq.f32.partialorder %v743_v62, 8.507059e+37 }
 0x7a5   : > { %v1454_v56 = vpop.eup %1453 }
 0x7a6   : > { %v735_v57 = vmul.f32 %v1454_v56, %v733_v55  ;;  %vm740_vm14 = vweird.f32 %v1454_v56 }
 0x7a7   : > { %vm741_vm1 = vmor %vm739_vm15, %vm740_vm14 }
 0x7a8   : > { %v736_v58 = vsub.f32 1.0, %v735_v57 }
 0x7aa   : > { %v737_v59 = vmul.f32 %v1454_v56, %v736_v58 }
 0x7ac   : > { %v738_v60 = vadd.f32 %v1454_v56, %v737_v59 }
 0x7ae   : > { %v742_v63 = vsel %vm741_vm1, %v1454_v56, %v738_v60 }
 0x7af   : > { %v747_v2 = vsel %vm744_vm2, %v746_v0, %v742_v63 }
 0x7b0   : > { %v750_v4 = vmul.f32 %v747_v2, %v690_v39 }
 0x80d   : > { %v753_v1 = vpop.permute.xlu1 %752 }
 0x80e   : > { %v755_v3 = vmul.f32 %v753_v1, %v747_v2 }
 0x810   : > { %757 = vrot.lane.b32.xlu2 %v755_v3, %s1607_s12  ;;  %v916_v3 = vld [vmem:[%s915_s25] sm:$0xff]  ;;  %s344_s25 = scalar_lea.vmem [#allocation9], %s1310_s28 }
 0x86a   : > { %v758_v5 = vpop.permute.xlu2 %757 }
 0x86b   : > { %v760_v6 = vadd.f32 %v758_v5, %v750_v4 }
 0x86d   : > { %1455 = vtanh.f32 %v760_v6 }
 0x873   : > { %v1456_v7 = vpop.eup %1455 }
 0x874   : > { %763 = vrot.lane.b32.xlu0 %v1456_v7, %s1606_s11 }
 0x8e6   : > { %v764_v8 = vpop.permute.xlu0 %763 }
 0x8e7   : > { %v766_v9 = vmul.f32 %v764_v8, %v747_v2 }
 0x8e9   : > { %768 = vrot.lane.b32.xlu1 %v766_v9, %s1607_s12 }
 0x95b   : > { %v769_v10 = vpop.permute.xlu1 %768 }
 0x95c   : > { %772 = vst.msk [vmem:[%s771_s16] sm:$0xff] %vm390_vm0, %v769_v10  ;;  %1336 = vmatmul.msk.f32.vlgmr.msrb.gmra.mxu2 %vm390_vm0, %v769_v10  ;;  %s911_s16 = scalar_lea.vmem [#allocation3], %s1338_s15  ;;  %s1348_s15 = sshll.u32 %s1593_s21, 3 }
 0x95d   : > { %s1093_s21 = scalar_lea.sflag [#allocation8], %s1713_s29 }
 0x9df   : > { %v796_v12 = vpop.f32.mrf.mxu2 }
 0x9e0   : > { %v799_v13 = vadd.f32 %v796_v12, %v776_v11 }
 0x9e2   : > { %1457 = vtanh.f32 %v799_v13  ;;  %v1337_v16 = vmul.f32 -1.442695, %v799_v13 }
 0x9e4   : > { %1459 = vpow2.f32 %v1337_v16 }
 0x9e8   : > { %v1458_v15 = vpop.eup %1457 }
 0x9e9   : > { %822 = vrot.lane.b32.xlu2 %v1458_v15, %s1606_s11 }
 0x9ea   : > { %v1460_v17 = vpop.eup %1459 }
 0x9eb   : > { %v803_v18 = vadd.f32 1.0, %v1460_v17 }
 0x9ed   : > { %1461 = vrcp.f32 %v803_v18  ;;  %v815_v24 = vand.u32 2147483648, %v803_v18  ;;  %vm809_vm4 = vweird.f32 %v803_v18  ;;  %v813_v25 = vand.u32 2147483647, %v803_v18 }
 0x9ef   : > { %v816_v27 = vor.u32 1.1754944e-38, %v815_v24  ;;  %vm814_vm6 = vcmp.eq.f32.partialorder %v813_v25, 8.507059e+37 }
 0x9f3   : > { %v1462_v19 = vpop.eup %1461 }
 0x9f4   : > { %v805_v20 = vmul.f32 %v1462_v19, %v803_v18  ;;  %vm810_vm3 = vweird.f32 %v1462_v19 }
 0x9f5   : > { %vm811_vm5 = vmor %vm809_vm4, %vm810_vm3 }
 0x9f6   : > { %v806_v21 = vsub.f32 1.0, %v805_v20 }
 0x9f8   : > { %v807_v22 = vmul.f32 %v1462_v19, %v806_v21 }
 0x9fa   : > { %v808_v23 = vadd.f32 %v1462_v19, %v807_v22 }
 0x9fc   : > { %v812_v26 = vsel %vm811_vm5, %v1462_v19, %v808_v23 }
 0x9fd   : > { %v817_v29 = vsel %vm814_vm6, %v816_v27, %v812_v26 }
 0x9fe   : > { %v820_v31 = vmul.f32 %v817_v29, %v760_v6 }
 0xa43   : > { %v823_v28 = vpop.permute.xlu2 %822 }
 0xa44   : > { %v825_v30 = vmul.f32 %v823_v28, %v817_v29 }
 0xa46   : > { %827 = vrot.lane.b32.xlu0 %v825_v30, %s1607_s12 }
 0xab8   : > { %v828_v32 = vpop.permute.xlu0 %827 }
 0xab9   : > { %v830_v33 = vadd.f32 %v828_v32, %v820_v31  ;;  %v986_v32 = vld [vmem:[%s985_s13] sm:$0xff] }
 0xabb   : > { %1463 = vtanh.f32 %v830_v33 }
 0xac1   : > { %v1464_v34 = vpop.eup %1463 }
 0xac2   : > { %833 = vrot.lane.b32.xlu1 %v1464_v34, %s1606_s11 }
 0xb34   : > { %v834_v35 = vpop.permute.xlu1 %833 }
 0xb35   : > { %v836_v36 = vmul.f32 %v834_v35, %v817_v29 }
 0xb37   : > { %838 = vrot.lane.b32.xlu2 %v836_v36, %s1607_s12 }
 0xb91   : > { %v839_v37 = vpop.permute.xlu2 %838 }
 0xb92   : > { %842 = vst.msk [vmem:[%s841_s27] sm:$0xff] %vm390_vm0, %v839_v37  ;;  %1339 = vmatmul.msk.f32.vlgmr.msra.gmra.mxu3 %vm390_vm0, %v839_v37  ;;  %s981_s27 = scalar_lea.vmem [#allocation3], %s1341_s24  ;;  %s1111_s24 = scalar_lea.hbm %s2013_s5, %s1348_s15 }
 0xb93   : > { %s1115_s13 = sshll.u32 %s1111_s24, 4  ;;  %s1116_s13 = int_to_ptr.hbm [resolvable:$true] %s1115_s13 }
 0xb99   : > { %v1062_v38 = vld [vmem:[#allocation3 + $0x18] sm:$0xff]  ;;  %v1063_v39 = vld [vmem:[#allocation3 + $0x20] sm:$0xff] }
 0xb9a   : > { %1070 = vst.msk [vmem:[%s1904_s14 + $0x18] sm:$0xff] %vm390_vm0, %v1062_v38 }
 0xb9b   : > { %1071 = vst.msk [vmem:[%s1904_s14 + $0x20] sm:$0xff] %vm390_vm0, %v1063_v39 }
 0xc15   : > { %v866_v41 = vpop.f32.mrf.mxu3 }
 0xc16   : > { %v869_v42 = vadd.f32 %v866_v41, %v846_v40 }
 0xc18   : > { %1465 = vtanh.f32 %v869_v42  ;;  %v1340_v44 = vmul.f32 -1.442695, %v869_v42 }
 0xc1a   : > { %1467 = vpow2.f32 %v1340_v44 }
 0xc1e   : > { %v1466_v43 = vpop.eup %1465 }
 0xc1f   : > { %892 = vrot.lane.b32.xlu0 %v1466_v43, %s1606_s11 }
 0xc20   : > { %v1468_v45 = vpop.eup %1467 }
 0xc21   : > { %v873_v46 = vadd.f32 1.0, %v1468_v45 }
 0xc23   : > { %1469 = vrcp.f32 %v873_v46  ;;  %v885_v52 = vand.u32 2147483648, %v873_v46  ;;  %vm879_vm8 = vweird.f32 %v873_v46  ;;  %v883_v14 = vand.u32 2147483647, %v873_v46 }
 0xc25   : > { %v886_v54 = vor.u32 1.1754944e-38, %v885_v52  ;;  %vm884_vm10 = vcmp.eq.f32.partialorder %v883_v14, 8.507059e+37 }
 0xc29   : > { %v1470_v47 = vpop.eup %1469 }
 0xc2a   : > { %v875_v48 = vmul.f32 %v1470_v47, %v873_v46  ;;  %vm880_vm7 = vweird.f32 %v1470_v47 }
 0xc2b   : > { %vm881_vm9 = vmor %vm879_vm8, %vm880_vm7 }
 0xc2c   : > { %v876_v49 = vsub.f32 1.0, %v875_v48 }
 0xc2e   : > { %v877_v50 = vmul.f32 %v1470_v47, %v876_v49 }
 0xc30   : > { %v878_v51 = vadd.f32 %v1470_v47, %v877_v50 }
 0xc32   : > { %v882_v53 = vsel %vm881_vm9, %v1470_v47, %v878_v51 }
 0xc33   : > { %v887_v56 = vsel %vm884_vm10, %v886_v54, %v882_v53 }
 0xc34   : > { %v890_v58 = vmul.f32 %v887_v56, %v830_v33 }
 0xc91   : > { %v893_v55 = vpop.permute.xlu0 %892 }
 0xc92   : > { %v895_v57 = vmul.f32 %v893_v55, %v887_v56 }
 0xc94   : > { %897 = vrot.lane.b32.xlu1 %v895_v57, %s1607_s12 }
 0xd06   : > { %v898_v59 = vpop.permute.xlu1 %897 }
 0xd07   : > { %v900_v60 = vadd.f32 %v898_v59, %v890_v58 }
 0xd09   : > { %1471 = vtanh.f32 %v900_v60 }
 0xd0f   : > { %v1472_v61 = vpop.eup %1471 }
 0xd10   : > { %903 = vrot.lane.b32.xlu2 %v1472_v61, %s1606_s11 }
 0xd6a   : > { %v904_v62 = vpop.permute.xlu2 %903 }
 0xd6b   : > { %v906_v63 = vmul.f32 %v904_v62, %v887_v56 }
 0xd6d   : > { %908 = vrot.lane.b32.xlu0 %v906_v63, %s1607_s12 }
 0xddf   : > { %v909_v0 = vpop.permute.xlu0 %908 }
 0xde0   : > { %912 = vst.msk [vmem:[%s911_s16] sm:$0xff] %vm390_vm0, %v909_v0  ;;  %1342 = vmatmul.msk.f32.vlgmr.msra.gmra.mxu1 %vm390_vm0, %v909_v0 }
 0xde7   : > { %v1061_v1 = vld [vmem:[#allocation3 + $0x10] sm:$0xff]  ;;  %v1064_v2 = vld [vmem:[#allocation3 + $0x28] sm:$0xff] }
 0xde8   : > { %1069 = vst.msk [vmem:[%s1904_s14 + $0x10] sm:$0xff] %vm390_vm0, %v1061_v1 }
 0xde9   : > { %1072 = vst.msk [vmem:[%s1904_s14 + $0x28] sm:$0xff] %vm390_vm0, %v1064_v2 }
 0xe5d   : > { %v936_v4 = vpop.f32.mrf.mxu1 }
 0xe5e   : > { %v939_v5 = vadd.f32 %v936_v4, %v916_v3 }
 0xe60   : > { %1473 = vtanh.f32 %v939_v5  ;;  %v1343_v7 = vmul.f32 -1.442695, %v939_v5 }
 0xe62   : > { %1475 = vpow2.f32 %v1343_v7 }
 0xe66   : > { %v1474_v6 = vpop.eup %1473 }
 0xe67   : > { %962 = vrot.lane.b32.xlu1 %v1474_v6, %s1606_s11 }
 0xe68   : > { %v1476_v8 = vpop.eup %1475 }
 0xe69   : > { %v943_v9 = vadd.f32 1.0, %v1476_v8 }
 0xe6b   : > { %1477 = vrcp.f32 %v943_v9  ;;  %v955_v16 = vand.u32 2147483648, %v943_v9  ;;  %vm949_vm12 = vweird.f32 %v943_v9  ;;  %v953_v17 = vand.u32 2147483647, %v943_v9 }
 0xe6d   : > { %v956_v19 = vor.u32 1.1754944e-38, %v955_v16  ;;  %vm954_vm14 = vcmp.eq.f32.partialorder %v953_v17, 8.507059e+37 }
 0xe71   : > { %v1478_v10 = vpop.eup %1477 }
 0xe72   : > { %v945_v11 = vmul.f32 %v1478_v10, %v943_v9  ;;  %vm950_vm11 = vweird.f32 %v1478_v10 }
 0xe73   : > { %vm951_vm13 = vmor %vm949_vm12, %vm950_vm11 }
 0xe74   : > { %v946_v12 = vsub.f32 1.0, %v945_v11 }
 0xe76   : > { %v947_v13 = vmul.f32 %v1478_v10, %v946_v12 }
 0xe78   : > { %v948_v15 = vadd.f32 %v1478_v10, %v947_v13 }
 0xe7a   : > { %v952_v18 = vsel %vm951_vm13, %v1478_v10, %v948_v15 }
 0xe7b   : > { %v957_v21 = vsel %vm954_vm14, %v956_v19, %v952_v18 }
 0xe7c   : > { %v960_v23 = vmul.f32 %v957_v21, %v900_v60 }
 0xed9   : > { %v963_v20 = vpop.permute.xlu1 %962 }
 0xeda   : > { %v965_v22 = vmul.f32 %v963_v20, %v957_v21 }
 0xedc   : > { %967 = vrot.lane.b32.xlu2 %v965_v22, %s1607_s12 }
 0xf36   : > { %v968_v24 = vpop.permute.xlu2 %967 }
 0xf37   : > { %v970_v25 = vadd.f32 %v968_v24, %v960_v23 }
 0xf39   : > { %1479 = vtanh.f32 %v970_v25 }
 0xf3f   : > { %v1480_v26 = vpop.eup %1479 }
 0xf40   : > { %973 = vrot.lane.b32.xlu0 %v1480_v26, %s1606_s11 }
 0xfb2   : > { %v974_v27 = vpop.permute.xlu0 %973 }
 0xfb3   : > { %v976_v28 = vmul.f32 %v974_v27, %v957_v21 }
 0xfb5   : > { %978 = vrot.lane.b32.xlu1 %v976_v28, %s1607_s12 }
0x1027   : > { %v979_v29 = vpop.permute.xlu1 %978 }
0x1028   : > { %982 = vst.msk [vmem:[%s981_s27] sm:$0xff] %vm390_vm0, %v979_v29  ;;  %1345 = vmatmul.msk.f32.vlgmr.msra.gmra.mxu2 %vm390_vm0, %v979_v29  ;;  %s1113_s27 = sshll.u32 %s344_s25, 4  ;;  %s1114_s27 = int_to_ptr.vmem [resolvable:$true] %s1113_s27 }
0x102f   : > { %v1060_v30 = vld [vmem:[#allocation3 + $0x8] sm:$0xff]  ;;  %v1065_v31 = vld [vmem:[#allocation3 + $0x30] sm:$0xff] }
0x1030   : > { %1068 = vst.msk [vmem:[%s1904_s14 + $0x8] sm:$0xff] %vm390_vm0, %v1060_v30 }
0x1031   : > { %1073 = vst.msk [vmem:[%s1904_s14 + $0x30] sm:$0xff] %vm390_vm0, %v1065_v31 }
0x10ab   : > { %v1006_v33 = vpop.f32.mrf.mxu2 }
0x10ac   : > { %v1009_v34 = vadd.f32 %v1006_v33, %v986_v32 }
0x10ae   : > { %1481 = vtanh.f32 %v1009_v34  ;;  %v1346_v36 = vmul.f32 -1.442695, %v1009_v34 }
0x10b0   : > { %1483 = vpow2.f32 %v1346_v36 }
0x10b4   : > { %v1482_v35 = vpop.eup %1481 }
0x10b5   : > { %1032 = vrot.lane.b32.xlu2 %v1482_v35, %s1606_s11 }
0x10b6   : > { %v1484_v37 = vpop.eup %1483 }
0x10b7   : > { %v1013_v38 = vadd.f32 1.0, %v1484_v37 }
0x10b9   : > { %1485 = vrcp.f32 %v1013_v38  ;;  %v1025_v44 = vand.u32 2147483648, %v1013_v38  ;;  %vm1019_vm1 = vweird.f32 %v1013_v38  ;;  %v1023_v45 = vand.u32 2147483647, %v1013_v38 }
0x10bb   : > { %v1026_v47 = vor.u32 1.1754944e-38, %v1025_v44  ;;  %vm1024_vm3 = vcmp.eq.f32.partialorder %v1023_v45, 8.507059e+37 }
0x10bf   : > { %v1486_v39 = vpop.eup %1485 }
0x10c0   : > { %v1015_v40 = vmul.f32 %v1486_v39, %v1013_v38  ;;  %vm1020_vm15 = vweird.f32 %v1486_v39 }
0x10c1   : > { %vm1021_vm2 = vmor %vm1019_vm1, %vm1020_vm15 }
0x10c2   : > { %v1016_v41 = vsub.f32 1.0, %v1015_v40 }
0x10c4   : > { %v1017_v42 = vmul.f32 %v1486_v39, %v1016_v41 }
0x10c6   : > { %v1018_v43 = vadd.f32 %v1486_v39, %v1017_v42 }
0x10c8   : > { %v1022_v46 = vsel %vm1021_vm2, %v1486_v39, %v1018_v43 }
0x10c9   : > { %v1027_v49 = vsel %vm1024_vm3, %v1026_v47, %v1022_v46 }
0x10ca   : > { %v1030_v51 = vmul.f32 %v1027_v49, %v970_v25 }
0x110f   : > { %v1033_v48 = vpop.permute.xlu2 %1032 }
0x1110   : > { %v1035_v50 = vmul.f32 %v1033_v48, %v1027_v49 }
0x1112   : > { %1037 = vrot.lane.b32.xlu0 %v1035_v50, %s1607_s12 }
0x1184   : > { %v1038_v52 = vpop.permute.xlu0 %1037 }
0x1185   : > { %v1040_v14 = vadd.f32 %v1038_v52, %v1030_v51 }
0x1187   : > { %1487 = vtanh.f32 %v1040_v14  ;;  %1055 = vrot.lane.b32.xlu0 %v1040_v14, %s1608_s30 }
0x118d   : > { %v1488_v53 = vpop.eup %1487 }
0x118e   : > { %1043 = vrot.lane.b32.xlu1 %v1488_v53, %s1606_s11  ;;  %s1051_s11 = scalar_lea.vmem [#allocation3], %s1344_s9 }
0x11f9   : > { %v1056_v54 = vpop.permute.xlu0 %1055 }
0x11fa   : > { %1058 = vst.msk [vmem:[#allocation5] sm:$0xff] %vm390_vm0, %v1056_v54 }
0x1200   : > { %v1044_v55 = vpop.permute.xlu1 %1043 }
0x1201   : > { %v1046_v56 = vmul.f32 %v1044_v55, %v1027_v49 }
0x1203   : > { %1048 = vrot.lane.b32.xlu2 %v1046_v56, %s1607_s12  ;;  %s1533_s12 = sshra.s32 %s1116_s13, 4  ;;  %s1534_s12 = int_to_ptr.hbm [resolvable:$true] %s1533_s12 }
0x1204   : > { %s1535_s30 = scalar_lea.hbm %s1534_s12, 8  ;;  %p1540_p10 = scmp.lt.s32.totalorder %s1534_s12, %s2013_s5 }
0x1205   : > { %p1536_p6 = scmp.ne.s32.totalorder %s1534_s12, %s1535_s30  ;;  %p1541_p13 = scmp.lt.s32.totalorder %s1539_s10, %s1535_s30 }
0x1207   : > { %p1537_p7 = pnand %p1536_p6, %p1690_p9  ;;  %p1542_p0 = por %p1541_p13, %p1540_p10 }
0x1209   : > { %p1538_p8 = pneg %p1537_p7 }
0x120b   : > { %p1543_p1 = pnand %p1542_p0, %p1538_p8 }
0x125d   : > { %v1049_v57 = vpop.permute.xlu2 %1048 }
0x125e   : > { %1052 = vst.msk [vmem:[%s1051_s11] sm:$0xff] %vm390_vm0, %v1049_v57 }
0x125f   : > { %1053 = vst.msk [vmem:[#allocation4] sm:$0xff] %vm390_vm0, %v1049_v57 }
0x1260   : > { %1078 = vst.msk [vmem:[%s344_s25] sm:$0xff] %vm390_vm0, %v1049_v57 }
0x1261   : > { %1546 = shalt.err (!%p1543_p1)
}
0x1262   : > { %1358 = dma.vmem_to_hbm [thread:$0]  (%p1690_p9), %s1114_s27, 128, %s1116_s13, %s1093_s21  }
0x1265   : > { %v1059_v58 = vld [vmem:[#allocation3] sm:$0xff]  ;;  %v1066_v59 = vld [vmem:[#allocation3 + $0x38] sm:$0xff] }
0x1266   : > { %1067 = vst.msk [vmem:[%s1904_s14] sm:$0xff] %vm390_vm0, %v1059_v58 }
0x1267   : > { %1074 = vst.msk [vmem:[%s1904_s14 + $0x38] sm:$0xff] %vm390_vm0, %v1066_v59 }
0x1268 PF: > { %s1143_s29 = sand.u32 1, %s1581_s18   ;;  %p1365_p2 = pnand %p1303_p12, %p1697_p11 }
0x1269   : > { %s1144_s17 = scalar_lea.sflag [#allocation8], %s1143_s29 }
0x126a   : > { %p1366_p3 = pneg %p1365_p2 }
0x126c   : > { %1576 = dma.done.wait (%p1366_p3), %s1144_s17, 128  }
0x126d   : > { %1578 = vsyncadd (%p1366_p3), %s1144_s17, 4294967168  ;;  %s22_s23 = sadd.s32 1, %s1601_s23   ;;  %s2018_s18 = smov %s1585_s19 }
0x126e   : > { %p19_p9 = scmp.ge.s32.totalorder %s22_s23, 4   ;;  %s2019_s19 = smov %s1589_s20 }
0x126f   : > { %s2020_s20 = smov %s1695_s7  ;;  %s2021_s21 = smov %s1597_s22 }
0x1270   : > { %s2022_s22 = smov %s2024_s26  ;;  %21 = sbr.rel (!%p19_p9) target bundleno = 6 (0x6), region = 126 }
0x1275   :  { %1150 = vsyncpa [#allocation7], 1 }
0x1276   :  { %1152 = vsyncpa [#allocation7 + $0x1], 1 }
0x1277   :  { %1153 = vsyncpa [#allocation8], 1 }
0x1278   :  { %1155 = vsyncpa [#allocation8 + $0x1], 1 }

</bundles_post_ra>
